<compile_context>
chip_gen: v5e
topology: v5e:2x2
jax: 0.10.0
libtpu: 0.0.40
codegen_flags: <defaults>
</compile_context>

<pallas_src>
import jax
import jax.numpy as jnp
from jax.experimental import pallas as pl
from jax.experimental.pallas import tpu as pltpu  # noqa: F401  (CompilerParams at larger sizes)


def _layer_norm(z, gamma, beta, eps=1e-5):
    mu = jnp.mean(z, axis=-1, keepdims=True)
    d = z - mu
    var = jnp.mean(d * d, axis=-1, keepdims=True)  # biased var, like nn.LayerNorm
    return d * jax.lax.rsqrt(var + eps) * gamma + beta


def transformer_block_kernel(
    x_ref,       # (S, B, D)  seq-first activations (full array, single grid step)
    wqkv_ref,    # (H, D, 3*hd)  per-head fused q/k/v weights (q part pre-scaled)
    bqkv_ref,    # (H, 1, 3*hd)  per-head fused q/k/v bias   (q part pre-scaled)
    wo_ref,      # (H, hd, D)    per-head out-projection weights
    w1_ref,      # (D, F)        FFN Linear 1 (pre-transposed)
    w2_ref,      # (F, D)        FFN Linear 2 (pre-transposed)
    vec_ref,     # (8, 128)      packed: bo, g1, be1, b1, b2, g2, be2
    o_ref,       # (S, B, D)
):
    S, B, D = x_ref.shape
    H, _, hd3 = wqkv_ref.shape
    hd = hd3 // 3
    F = w1_ref.shape[1]

    # Packed small vectors: one lane-dense tile, sliced in-register.
    vecs = vec_ref[...]
    bo, g1, be1 = vecs[0, :D], vecs[1, :D], vecs[2, :D]
    b1 = vecs[3, :F]
    b2, g2, be2 = vecs[4, :D], vecs[5, :D], vecs[6, :D]

    wqkv = wqkv_ref[...]
    bqkv = bqkv_ref[...]
    wo_h = wo_ref[...]
    w1 = w1_ref[...]
    w2 = w2_ref[...]

    x_all = x_ref[...]                          # (S, B, D)

    # B is tiny and static here; at real sizes this would be a parallel grid axis.
    for b in range(B):
        x = x_all[:, b, :]                      # (S, D)

        # --- fused per-head q/k/v projection: one batched MXU contraction ---
        xh = jnp.broadcast_to(x[None], (H, S, D))
        qkv = jnp.einsum("hsd,hdk->hsk", xh, wqkv,
                         preferred_element_type=jnp.float32) + bqkv   # (H, S, 3*hd)
        q = qkv[..., :hd]                       # already scaled by 1/sqrt(hd)
        k = qkv[..., hd:2 * hd]
        v = qkv[..., 2 * hd:]

        # --- attention with heads batched on the leading dim ---
        s = jnp.einsum("hqc,hkc->hqk", q, k, preferred_element_type=jnp.float32)
        s = s - jnp.max(s, axis=-1, keepdims=True)
        p = jnp.exp(s)
        p = p * pl.reciprocal(jnp.sum(p, axis=-1, keepdims=True), approx=True)
        ctx = jnp.einsum("hqk,hkc->hqc", p, v, preferred_element_type=jnp.float32)

        # --- out projection: head-batched matmul, reduced over heads (== concat @ Wo.T) ---
        attn = jnp.einsum("hqc,hcd->hqd", ctx, wo_h,
                          preferred_element_type=jnp.float32)
        attn = jnp.sum(attn, axis=0) + bo       # (S, D)

        # --- residual + LayerNorm 1 ---
        x1 = _layer_norm(x + attn, g1, be1)

        # --- FFN: Linear -> ReLU -> Linear ---
        h1 = jnp.maximum(jnp.dot(x1, w1, preferred_element_type=jnp.float32) + b1, 0.0)
        ffn = jnp.dot(h1, w2, preferred_element_type=jnp.float32) + b2

        # --- residual + LayerNorm 2 ---
        o_ref[:, b, :] = _layer_norm(x1 + ffn, g2, be2)


def transformer_block(x_sbd, params, num_heads):
    """x_sbd: (S, B, D) float32, PyTorch seq-first (batch_first=False) layout."""
    S, B, D = x_sbd.shape
    H = num_heads
    hd = D // H
    F = params["w1"].shape[0]
    scale = 1.0 / jnp.sqrt(jnp.float32(hd))

    # ---------- host-side (one-time) weight preparation ----------
    wq, wk, wv = jnp.split(params["in_proj_w"], 3, axis=0)     # (D, D) each, rows = out feats
    bq, bk, bv = jnp.split(params["in_proj_b"], 3, axis=0)     # (D,) each

    def per_head_in(w):        # (D_out, D_in) -> (H, D_in, hd): y_h = x @ w_h
        return w.reshape(H, hd, D).transpose(0, 2, 1)

    wqkv = jnp.concatenate(
        [per_head_in(wq) * scale, per_head_in(wk), per_head_in(wv)], axis=-1)  # (H, D, 3*hd)
    bqkv = jnp.concatenate(
        [(bq * scale).reshape(H, 1, hd), bk.reshape(H, 1, hd), bv.reshape(H, 1, hd)],
        axis=-1)                                                               # (H, 1, 3*hd)
    wo_h = params["wo"].T.reshape(H, hd, D)                                    # (H, hd, D)
    w1_t = params["w1"].T                                                      # (D, F)
    w2_t = params["w2"].T                                                      # (F, D)

    # Pack the remaining small vectors into one lane-dense (8, 128) slab.
    LANES = 128
    def row(v):
        return jnp.pad(v.astype(jnp.float32), (0, LANES - v.shape[0]))
    vec = jnp.stack([
        row(params["bo"]), row(params["g1"]), row(params["be1"]),
        row(params["b1"]), row(params["b2"]), row(params["g2"]),
        row(params["be2"]), jnp.zeros((LANES,), jnp.float32),
    ])                                                                         # (8, 128)

    # Single grid step: full arrays in VMEM (everything here is a few KiB).
    out = pl.pallas_call(
        transformer_block_kernel,
        out_shape=jax.ShapeDtypeStruct((S, B, D), jnp.float32),
    )(x_sbd, wqkv, bqkv, wo_h, w1_t, w2_t, vec)
    return out


def _reference(x_sbd, params, num_heads):
    """Pure-JAX reference of the same math (silent correctness check)."""
    S, B, D = x_sbd.shape
    H = num_heads
    hd = D // H
    x = jnp.transpose(x_sbd, (1, 0, 2))                        # (B, S, D)
    wq, wk, wv = jnp.split(params["in_proj_w"], 3, axis=0)
    bq, bk, bv = jnp.split(params["in_proj_b"], 3, axis=0)
    q = x @ wq.T + bq
    k = x @ wk.T + bk
    v = x @ wv.T + bv
    q = q.reshape(B, S, H, hd).transpose(0, 2, 1, 3)
    k = k.reshape(B, S, H, hd).transpose(0, 2, 1, 3)
    v = v.reshape(B, S, H, hd).transpose(0, 2, 1, 3)
    s = jnp.einsum("bhqc,bhkc->bhqk", q, k) / jnp.sqrt(jnp.float32(hd))
    p = jax.nn.softmax(s, axis=-1)
    a = jnp.einsum("bhqk,bhkc->bhqc", p, v).transpose(0, 2, 1, 3).reshape(B, S, D)
    a = a @ params["wo"].T + params["bo"]
    x1 = _layer_norm(x + a, params["g1"], params["be1"])
    h1 = jnp.maximum(x1 @ params["w1"].T + params["b1"], 0.0)
    f = h1 @ params["w2"].T + params["b2"]
    x2 = _layer_norm(x1 + f, params["g2"], params["be2"])
    return jnp.transpose(x2, (1, 0, 2))


if __name__ == "__main__":
    # small shapes implied by the module: seq=8, batch=2, dim=32, heads=4, ff_dim=64
    S, B, D, H, F = 8, 2, 32, 4, 64

    key = jax.random.PRNGKey(0)
    ks = jax.random.split(key, 9)

    def init(k, shape, scale=0.05):
        return (scale * jax.random.normal(k, shape)).astype(jnp.float32)

    params = {
        # nn.MultiheadAttention: in_proj_weight (3D, D), in_proj_bias (3D,)
        "in_proj_w": init(ks[0], (3 * D, D)),
        "in_proj_b": init(ks[1], (3 * D,)),
        # out_proj: Linear(D, D)
        "wo": init(ks[2], (D, D)), "bo": init(ks[3], (D,)),
        # LayerNorm1
        "g1": jnp.ones((D,), jnp.float32), "be1": jnp.zeros((D,), jnp.float32),
        # FFN: Linear(D, F), Linear(F, D)
        "w1": init(ks[4], (F, D)), "b1": init(ks[5], (F,)),
        "w2": init(ks[6], (D, F)), "b2": init(ks[7], (D,)),
        # LayerNorm2
        "g2": jnp.ones((D,), jnp.float32), "be2": jnp.zeros((D,), jnp.float32),
    }

    x = jax.random.normal(ks[8], (S, B, D), dtype=jnp.float32)

    out = jax.block_until_ready(transformer_block(x, params, num_heads=H))
    ref = jax.block_until_ready(_reference(x, params, num_heads=H))

    assert out.shape == (S, B, D)
    err = float(jnp.max(jnp.abs(out - ref)))
    # tolerance leaves headroom for the approximate (EUP) softmax reciprocal
    assert err < 2e-3, f"max abs err {err}"

    print("KERNEL_OK")
</pallas_src>

<mosaic_0001>
module attributes {stable_mosaic.version = 11 : i64} {
  func.func @transformer_block_kernel(%arg0: memref<8x2x32xf32, #tpu.memory_space<vmem>>, %arg1: memref<4x32x24xf32, #tpu.memory_space<vmem>>, %arg2: memref<4x1x24xf32, #tpu.memory_space<vmem>>, %arg3: memref<4x8x32xf32, #tpu.memory_space<vmem>>, %arg4: memref<32x64xf32, #tpu.memory_space<vmem>>, %arg5: memref<64x32xf32, #tpu.memory_space<vmem>>, %arg6: memref<8x128xf32, #tpu.memory_space<vmem>>, %arg7: memref<8x2x32xf32, #tpu.memory_space<vmem>>) attributes {dimension_semantics = [], scalar_prefetch = 0 : i64, scratch_operands = 0 : i64, tpu.core_type = #tpu.core_type<tc>} {
    %c0 = arith.constant 0 : index
    %c0_0 = arith.constant 0 : index
    %0 = vector.load %arg6[%c0, %c0_0] : memref<8x128xf32, #tpu.memory_space<vmem>>, vector<8x128xf32>
    %1 = vector.extract_strided_slice %0 {offsets = [0, 0], sizes = [1, 32], strides = [1, 1]} : vector<8x128xf32> to vector<1x32xf32>
    %2 = vector.shape_cast %1 : vector<1x32xf32> to vector<32xf32>
    %3 = vector.extract_strided_slice %0 {offsets = [1, 0], sizes = [1, 32], strides = [1, 1]} : vector<8x128xf32> to vector<1x32xf32>
    %4 = vector.shape_cast %3 : vector<1x32xf32> to vector<32xf32>
    %5 = vector.extract_strided_slice %0 {offsets = [2, 0], sizes = [1, 32], strides = [1, 1]} : vector<8x128xf32> to vector<1x32xf32>
    %6 = vector.shape_cast %5 : vector<1x32xf32> to vector<32xf32>
    %7 = vector.extract_strided_slice %0 {offsets = [3, 0], sizes = [1, 64], strides = [1, 1]} : vector<8x128xf32> to vector<1x64xf32>
    %8 = vector.shape_cast %7 : vector<1x64xf32> to vector<64xf32>
    %9 = vector.extract_strided_slice %0 {offsets = [4, 0], sizes = [1, 32], strides = [1, 1]} : vector<8x128xf32> to vector<1x32xf32>
    %10 = vector.shape_cast %9 : vector<1x32xf32> to vector<32xf32>
    %11 = vector.extract_strided_slice %0 {offsets = [5, 0], sizes = [1, 32], strides = [1, 1]} : vector<8x128xf32> to vector<1x32xf32>
    %12 = vector.shape_cast %11 : vector<1x32xf32> to vector<32xf32>
    %13 = vector.extract_strided_slice %0 {offsets = [6, 0], sizes = [1, 32], strides = [1, 1]} : vector<8x128xf32> to vector<1x32xf32>
    %14 = vector.shape_cast %13 : vector<1x32xf32> to vector<32xf32>
    %c0_1 = arith.constant 0 : index
    %c0_2 = arith.constant 0 : index
    %c0_3 = arith.constant 0 : index
    %15 = vector.load %arg1[%c0_1, %c0_2, %c0_3] : memref<4x32x24xf32, #tpu.memory_space<vmem>>, vector<4x32x24xf32>
    %c0_4 = arith.constant 0 : index
    %c0_5 = arith.constant 0 : index
    %c0_6 = arith.constant 0 : index
    %16 = vector.load %arg2[%c0_4, %c0_5, %c0_6] : memref<4x1x24xf32, #tpu.memory_space<vmem>>, vector<4x1x24xf32>
    %c0_7 = arith.constant 0 : index
    %c0_8 = arith.constant 0 : index
    %c0_9 = arith.constant 0 : index
    %17 = vector.load %arg3[%c0_7, %c0_8, %c0_9] : memref<4x8x32xf32, #tpu.memory_space<vmem>>, vector<4x8x32xf32>
    %c0_10 = arith.constant 0 : index
    %c0_11 = arith.constant 0 : index
    %18 = vector.load %arg4[%c0_10, %c0_11] : memref<32x64xf32, #tpu.memory_space<vmem>>, vector<32x64xf32>
    %c0_12 = arith.constant 0 : index
    %c0_13 = arith.constant 0 : index
    %19 = vector.load %arg5[%c0_12, %c0_13] : memref<64x32xf32, #tpu.memory_space<vmem>>, vector<64x32xf32>
    %c0_14 = arith.constant 0 : index
    %c0_15 = arith.constant 0 : index
    %c0_16 = arith.constant 0 : index
    %20 = vector.load %arg0[%c0_14, %c0_15, %c0_16] : memref<8x2x32xf32, #tpu.memory_space<vmem>>, vector<8x2x32xf32>
    %21 = vector.extract_strided_slice %20 {offsets = [0, 0, 0], sizes = [8, 1, 32], strides = [1, 1, 1]} : vector<8x2x32xf32> to vector<8x1x32xf32>
    %22 = vector.shape_cast %21 : vector<8x1x32xf32> to vector<8x32xf32>
    %23 = vector.shape_cast %22 : vector<8x32xf32> to vector<1x8x32xf32>
    %24 = vector.shape_cast %23 : vector<1x8x32xf32> to vector<1x8x32xf32>
    %25 = vector.broadcast %24 : vector<1x8x32xf32> to vector<4x8x32xf32>
    "tpu.trace_start"() <{level = 10 : i32, message = "hsd,hdk->hsk"}> : () -> ()
    %cst = arith.constant dense<0.000000e+00> : vector<4x8x24xf32>
    %26 = tpu.matmul %25, %15, %cst {dimension_numbers = #tpu.dot_dimension_numbers<[2], [1], [1], [2], [0, 0, 0, 1, 1, 2], [0], [0]>} : vector<4x8x32xf32>, vector<4x32x24xf32>, vector<4x8x24xf32> -> vector<4x8x24xf32>
    "tpu.trace_stop"() : () -> ()
    %27 = vector.broadcast %16 : vector<4x1x24xf32> to vector<4x8x24xf32>
    %28 = arith.addf %26, %27 : vector<4x8x24xf32>
    %29 = vector.extract_strided_slice %28 {offsets = [0, 0, 0], sizes = [4, 8, 8], strides = [1, 1, 1]} : vector<4x8x24xf32> to vector<4x8x8xf32>
    %30 = vector.extract_strided_slice %28 {offsets = [0, 0, 8], sizes = [4, 8, 8], strides = [1, 1, 1]} : vector<4x8x24xf32> to vector<4x8x8xf32>
    %31 = vector.extract_strided_slice %28 {offsets = [0, 0, 16], sizes = [4, 8, 8], strides = [1, 1, 1]} : vector<4x8x24xf32> to vector<4x8x8xf32>
    "tpu.trace_start"() <{level = 10 : i32, message = "hqc,hkc->hqk"}> : () -> ()
    %cst_17 = arith.constant dense<0.000000e+00> : vector<4x8x8xf32>
    %32 = tpu.matmul %29, %30, %cst_17 {dimension_numbers = #tpu.dot_dimension_numbers<[2], [2], [1], [1], [0, 0, 0, 1, 1, 1], [0], [0]>} : vector<4x8x8xf32>, vector<4x8x8xf32>, vector<4x8x8xf32> -> vector<4x8x8xf32>
    "tpu.trace_stop"() : () -> ()
    %cst_18 = arith.constant dense<0xFF800000> : vector<4x8xf32>
    %33 = vector.multi_reduction <maximumf>, %32, %cst_18 [2] : vector<4x8x8xf32> to vector<4x8xf32>
    %34 = vector.shape_cast %33 : vector<4x8xf32> to vector<4x8x1xf32>
    %35 = vector.broadcast %34 : vector<4x8x1xf32> to vector<4x8x8xf32>
    %36 = arith.subf %32, %35 : vector<4x8x8xf32>
    %37 = math.exp %36 : vector<4x8x8xf32>
    %cst_19 = arith.constant dense<0.000000e+00> : vector<4x8xf32>
    %38 = vector.multi_reduction <add>, %37, %cst_19 [2] : vector<4x8x8xf32> to vector<4x8xf32>
    %39 = vector.shape_cast %38 : vector<4x8xf32> to vector<4x8x1xf32>
    %40 = tpu.reciprocal %39 {approx = true} : vector<4x8x1xf32> -> vector<4x8x1xf32>
    %41 = vector.broadcast %40 : vector<4x8x1xf32> to vector<4x8x8xf32>
    %42 = arith.mulf %37, %41 : vector<4x8x8xf32>
    "tpu.trace_start"() <{level = 10 : i32, message = "hqk,hkc->hqc"}> : () -> ()
    %cst_20 = arith.constant dense<0.000000e+00> : vector<4x8x8xf32>
    %43 = tpu.matmul %42, %31, %cst_20 {dimension_numbers = #tpu.dot_dimension_numbers<[2], [1], [1], [2], [0, 0, 0, 1, 1, 2], [0], [0]>} : vector<4x8x8xf32>, vector<4x8x8xf32>, vector<4x8x8xf32> -> vector<4x8x8xf32>
    "tpu.trace_stop"() : () -> ()
    "tpu.trace_start"() <{level = 10 : i32, message = "hqc,hcd->hqd"}> : () -> ()
    %cst_21 = arith.constant dense<0.000000e+00> : vector<4x8x32xf32>
    %44 = tpu.matmul %43, %17, %cst_21 {dimension_numbers = #tpu.dot_dimension_numbers<[2], [1], [1], [2], [0, 0, 0, 1, 1, 2], [0], [0]>} : vector<4x8x8xf32>, vector<4x8x32xf32>, vector<4x8x32xf32> -> vector<4x8x32xf32>
    "tpu.trace_stop"() : () -> ()
    %cst_22 = arith.constant dense<0.000000e+00> : vector<8x32xf32>
    %45 = vector.multi_reduction <add>, %44, %cst_22 [0] : vector<4x8x32xf32> to vector<8x32xf32>
    %46 = vector.shape_cast %2 : vector<32xf32> to vector<1x32xf32>
    %47 = vector.broadcast %46 : vector<1x32xf32> to vector<8x32xf32>
    %48 = arith.addf %45, %47 : vector<8x32xf32>
    %49 = arith.addf %22, %48 : vector<8x32xf32>
    %cst_23 = arith.constant dense<0.000000e+00> : vector<8xf32>
    %50 = vector.multi_reduction <add>, %49, %cst_23 [1] : vector<8x32xf32> to vector<8xf32>
    %51 = vector.shape_cast %50 : vector<8xf32> to vector<8x1xf32>
    %cst_24 = arith.constant 3.200000e+01 : f32
    %52 = vector.broadcast %cst_24 : f32 to vector<8x1xf32>
    %53 = arith.divf %51, %52 : vector<8x1xf32>
    %54 = vector.broadcast %53 : vector<8x1xf32> to vector<8x32xf32>
    %55 = arith.subf %49, %54 : vector<8x32xf32>
    %56 = arith.mulf %55, %55 : vector<8x32xf32>
    %cst_25 = arith.constant dense<0.000000e+00> : vector<8xf32>
    %57 = vector.multi_reduction <add>, %56, %cst_25 [1] : vector<8x32xf32> to vector<8xf32>
    %58 = vector.shape_cast %57 : vector<8xf32> to vector<8x1xf32>
    %cst_26 = arith.constant 3.200000e+01 : f32
    %59 = vector.broadcast %cst_26 : f32 to vector<8x1xf32>
    %60 = arith.divf %58, %59 : vector<8x1xf32>
    %cst_27 = arith.constant 9.99999974E-6 : f32
    %61 = vector.broadcast %cst_27 : f32 to vector<8x1xf32>
    %62 = arith.addf %60, %61 : vector<8x1xf32>
    %63 = math.rsqrt %62 : vector<8x1xf32>
    %64 = vector.broadcast %63 : vector<8x1xf32> to vector<8x32xf32>
    %65 = arith.mulf %55, %64 : vector<8x32xf32>
    %66 = vector.shape_cast %4 : vector<32xf32> to vector<1x32xf32>
    %67 = vector.broadcast %66 : vector<1x32xf32> to vector<8x32xf32>
    %68 = arith.mulf %65, %67 : vector<8x32xf32>
    %69 = vector.shape_cast %6 : vector<32xf32> to vector<1x32xf32>
    %70 = vector.broadcast %69 : vector<1x32xf32> to vector<8x32xf32>
    %71 = arith.addf %68, %70 : vector<8x32xf32>
    %cst_28 = arith.constant dense<0.000000e+00> : vector<8x64xf32>
    %72 = tpu.matmul %71, %18, %cst_28 {dimension_numbers = #tpu.dot_dimension_numbers<[1], [0], [0], [1], [0, 0, 1, 1], [], []>} : vector<8x32xf32>, vector<32x64xf32>, vector<8x64xf32> -> vector<8x64xf32>
    %73 = vector.shape_cast %8 : vector<64xf32> to vector<1x64xf32>
    %74 = vector.broadcast %73 : vector<1x64xf32> to vector<8x64xf32>
    %75 = arith.addf %72, %74 : vector<8x64xf32>
    %cst_29 = arith.constant 0.000000e+00 : f32
    %76 = vector.broadcast %cst_29 : f32 to vector<8x64xf32>
    %77 = arith.maximumf %75, %76 : vector<8x64xf32>
    %cst_30 = arith.constant dense<0.000000e+00> : vector<8x32xf32>
    %78 = tpu.matmul %77, %19, %cst_30 {dimension_numbers = #tpu.dot_dimension_numbers<[1], [0], [0], [1], [0, 0, 1, 1], [], []>} : vector<8x64xf32>, vector<64x32xf32>, vector<8x32xf32> -> vector<8x32xf32>
    %79 = vector.shape_cast %10 : vector<32xf32> to vector<1x32xf32>
    %80 = vector.broadcast %79 : vector<1x32xf32> to vector<8x32xf32>
    %81 = arith.addf %78, %80 : vector<8x32xf32>
    %82 = arith.addf %71, %81 : vector<8x32xf32>
    %cst_31 = arith.constant dense<0.000000e+00> : vector<8xf32>
    %83 = vector.multi_reduction <add>, %82, %cst_31 [1] : vector<8x32xf32> to vector<8xf32>
    %84 = vector.shape_cast %83 : vector<8xf32> to vector<8x1xf32>
    %cst_32 = arith.constant 3.200000e+01 : f32
    %85 = vector.broadcast %cst_32 : f32 to vector<8x1xf32>
    %86 = arith.divf %84, %85 : vector<8x1xf32>
    %87 = vector.broadcast %86 : vector<8x1xf32> to vector<8x32xf32>
    %88 = arith.subf %82, %87 : vector<8x32xf32>
    %89 = arith.mulf %88, %88 : vector<8x32xf32>
    %cst_33 = arith.constant dense<0.000000e+00> : vector<8xf32>
    %90 = vector.multi_reduction <add>, %89, %cst_33 [1] : vector<8x32xf32> to vector<8xf32>
    %91 = vector.shape_cast %90 : vector<8xf32> to vector<8x1xf32>
    %cst_34 = arith.constant 3.200000e+01 : f32
    %92 = vector.broadcast %cst_34 : f32 to vector<8x1xf32>
    %93 = arith.divf %91, %92 : vector<8x1xf32>
    %cst_35 = arith.constant 9.99999974E-6 : f32
    %94 = vector.broadcast %cst_35 : f32 to vector<8x1xf32>
    %95 = arith.addf %93, %94 : vector<8x1xf32>
    %96 = math.rsqrt %95 : vector<8x1xf32>
    %97 = vector.broadcast %96 : vector<8x1xf32> to vector<8x32xf32>
    %98 = arith.mulf %88, %97 : vector<8x32xf32>
    %99 = vector.shape_cast %12 : vector<32xf32> to vector<1x32xf32>
    %100 = vector.broadcast %99 : vector<1x32xf32> to vector<8x32xf32>
    %101 = arith.mulf %98, %100 : vector<8x32xf32>
    %102 = vector.shape_cast %14 : vector<32xf32> to vector<1x32xf32>
    %103 = vector.broadcast %102 : vector<1x32xf32> to vector<8x32xf32>
    %104 = arith.addf %101, %103 : vector<8x32xf32>
    %c0_36 = arith.constant 0 : index
    %c0_37 = arith.constant 0 : index
    %c0_38 = arith.constant 0 : index
    %105 = vector.load %arg7[%c0_36, %c0_37, %c0_38] : memref<8x2x32xf32, #tpu.memory_space<vmem>>, vector<8x1x32xf32>
    %106 = vector.shape_cast %105 : vector<8x1x32xf32> to vector<8x32xf32>
    %107 = vector.shape_cast %104 : vector<8x32xf32> to vector<8x1x32xf32>
    tpu.vector_store %arg7[%c0_36, %c0_37, %c0_38], %107 {strides = array<i32>} : memref<8x2x32xf32, #tpu.memory_space<vmem>>, vector<8x1x32xf32>,
    %108 = vector.extract_strided_slice %20 {offsets = [0, 1, 0], sizes = [8, 1, 32], strides = [1, 1, 1]} : vector<8x2x32xf32> to vector<8x1x32xf32>
    %109 = vector.shape_cast %108 : vector<8x1x32xf32> to vector<8x32xf32>
    %110 = vector.shape_cast %109 : vector<8x32xf32> to vector<1x8x32xf32>
    %111 = vector.shape_cast %110 : vector<1x8x32xf32> to vector<1x8x32xf32>
    %112 = vector.broadcast %111 : vector<1x8x32xf32> to vector<4x8x32xf32>
    "tpu.trace_start"() <{level = 10 : i32, message = "hsd,hdk->hsk"}> : () -> ()
    %cst_39 = arith.constant dense<0.000000e+00> : vector<4x8x24xf32>
    %113 = tpu.matmul %112, %15, %cst_39 {dimension_numbers = #tpu.dot_dimension_numbers<[2], [1], [1], [2], [0, 0, 0, 1, 1, 2], [0], [0]>} : vector<4x8x32xf32>, vector<4x32x24xf32>, vector<4x8x24xf32> -> vector<4x8x24xf32>
    "tpu.trace_stop"() : () -> ()
    %114 = vector.broadcast %16 : vector<4x1x24xf32> to vector<4x8x24xf32>
    %115 = arith.addf %113, %114 : vector<4x8x24xf32>
    %116 = vector.extract_strided_slice %115 {offsets = [0, 0, 0], sizes = [4, 8, 8], strides = [1, 1, 1]} : vector<4x8x24xf32> to vector<4x8x8xf32>
    %117 = vector.extract_strided_slice %115 {offsets = [0, 0, 8], sizes = [4, 8, 8], strides = [1, 1, 1]} : vector<4x8x24xf32> to vector<4x8x8xf32>
    %118 = vector.extract_strided_slice %115 {offsets = [0, 0, 16], sizes = [4, 8, 8], strides = [1, 1, 1]} : vector<4x8x24xf32> to vector<4x8x8xf32>
    "tpu.trace_start"() <{level = 10 : i32, message = "hqc,hkc->hqk"}> : () -> ()
    %cst_40 = arith.constant dense<0.000000e+00> : vector<4x8x8xf32>
    %119 = tpu.matmul %116, %117, %cst_40 {dimension_numbers = #tpu.dot_dimension_numbers<[2], [2], [1], [1], [0, 0, 0, 1, 1, 1], [0], [0]>} : vector<4x8x8xf32>, vector<4x8x8xf32>, vector<4x8x8xf32> -> vector<4x8x8xf32>
    "tpu.trace_stop"() : () -> ()
    %cst_41 = arith.constant dense<0xFF800000> : vector<4x8xf32>
    %120 = vector.multi_reduction <maximumf>, %119, %cst_41 [2] : vector<4x8x8xf32> to vector<4x8xf32>
    %121 = vector.shape_cast %120 : vector<4x8xf32> to vector<4x8x1xf32>
    %122 = vector.broadcast %121 : vector<4x8x1xf32> to vector<4x8x8xf32>
    %123 = arith.subf %119, %122 : vector<4x8x8xf32>
    %124 = math.exp %123 : vector<4x8x8xf32>
    %cst_42 = arith.constant dense<0.000000e+00> : vector<4x8xf32>
    %125 = vector.multi_reduction <add>, %124, %cst_42 [2] : vector<4x8x8xf32> to vector<4x8xf32>
    %126 = vector.shape_cast %125 : vector<4x8xf32> to vector<4x8x1xf32>
    %127 = tpu.reciprocal %126 {approx = true} : vector<4x8x1xf32> -> vector<4x8x1xf32>
    %128 = vector.broadcast %127 : vector<4x8x1xf32> to vector<4x8x8xf32>
    %129 = arith.mulf %124, %128 : vector<4x8x8xf32>
    "tpu.trace_start"() <{level = 10 : i32, message = "hqk,hkc->hqc"}> : () -> ()
    %cst_43 = arith.constant dense<0.000000e+00> : vector<4x8x8xf32>
    %130 = tpu.matmul %129, %118, %cst_43 {dimension_numbers = #tpu.dot_dimension_numbers<[2], [1], [1], [2], [0, 0, 0, 1, 1, 2], [0], [0]>} : vector<4x8x8xf32>, vector<4x8x8xf32>, vector<4x8x8xf32> -> vector<4x8x8xf32>
    "tpu.trace_stop"() : () -> ()
    "tpu.trace_start"() <{level = 10 : i32, message = "hqc,hcd->hqd"}> : () -> ()
    %cst_44 = arith.constant dense<0.000000e+00> : vector<4x8x32xf32>
    %131 = tpu.matmul %130, %17, %cst_44 {dimension_numbers = #tpu.dot_dimension_numbers<[2], [1], [1], [2], [0, 0, 0, 1, 1, 2], [0], [0]>} : vector<4x8x8xf32>, vector<4x8x32xf32>, vector<4x8x32xf32> -> vector<4x8x32xf32>
    "tpu.trace_stop"() : () -> ()
    %cst_45 = arith.constant dense<0.000000e+00> : vector<8x32xf32>
    %132 = vector.multi_reduction <add>, %131, %cst_45 [0] : vector<4x8x32xf32> to vector<8x32xf32>
    %133 = vector.shape_cast %2 : vector<32xf32> to vector<1x32xf32>
    %134 = vector.broadcast %133 : vector<1x32xf32> to vector<8x32xf32>
    %135 = arith.addf %132, %134 : vector<8x32xf32>
    %136 = arith.addf %109, %135 : vector<8x32xf32>
    %cst_46 = arith.constant dense<0.000000e+00> : vector<8xf32>
    %137 = vector.multi_reduction <add>, %136, %cst_46 [1] : vector<8x32xf32> to vector<8xf32>
    %138 = vector.shape_cast %137 : vector<8xf32> to vector<8x1xf32>
    %cst_47 = arith.constant 3.200000e+01 : f32
    %139 = vector.broadcast %cst_47 : f32 to vector<8x1xf32>
    %140 = arith.divf %138, %139 : vector<8x1xf32>
    %141 = vector.broadcast %140 : vector<8x1xf32> to vector<8x32xf32>
    %142 = arith.subf %136, %141 : vector<8x32xf32>
    %143 = arith.mulf %142, %142 : vector<8x32xf32>
    %cst_48 = arith.constant dense<0.000000e+00> : vector<8xf32>
    %144 = vector.multi_reduction <add>, %143, %cst_48 [1] : vector<8x32xf32> to vector<8xf32>
    %145 = vector.shape_cast %144 : vector<8xf32> to vector<8x1xf32>
    %cst_49 = arith.constant 3.200000e+01 : f32
    %146 = vector.broadcast %cst_49 : f32 to vector<8x1xf32>
    %147 = arith.divf %145, %146 : vector<8x1xf32>
    %cst_50 = arith.constant 9.99999974E-6 : f32
    %148 = vector.broadcast %cst_50 : f32 to vector<8x1xf32>
    %149 = arith.addf %147, %148 : vector<8x1xf32>
    %150 = math.rsqrt %149 : vector<8x1xf32>
    %151 = vector.broadcast %150 : vector<8x1xf32> to vector<8x32xf32>
    %152 = arith.mulf %142, %151 : vector<8x32xf32>
    %153 = vector.shape_cast %4 : vector<32xf32> to vector<1x32xf32>
    %154 = vector.broadcast %153 : vector<1x32xf32> to vector<8x32xf32>
    %155 = arith.mulf %152, %154 : vector<8x32xf32>
    %156 = vector.shape_cast %6 : vector<32xf32> to vector<1x32xf32>
    %157 = vector.broadcast %156 : vector<1x32xf32> to vector<8x32xf32>
    %158 = arith.addf %155, %157 : vector<8x32xf32>
    %cst_51 = arith.constant dense<0.000000e+00> : vector<8x64xf32>
    %159 = tpu.matmul %158, %18, %cst_51 {dimension_numbers = #tpu.dot_dimension_numbers<[1], [0], [0], [1], [0, 0, 1, 1], [], []>} : vector<8x32xf32>, vector<32x64xf32>, vector<8x64xf32> -> vector<8x64xf32>
    %160 = vector.shape_cast %8 : vector<64xf32> to vector<1x64xf32>
    %161 = vector.broadcast %160 : vector<1x64xf32> to vector<8x64xf32>
    %162 = arith.addf %159, %161 : vector<8x64xf32>
    %cst_52 = arith.constant 0.000000e+00 : f32
    %163 = vector.broadcast %cst_52 : f32 to vector<8x64xf32>
    %164 = arith.maximumf %162, %163 : vector<8x64xf32>
    %cst_53 = arith.constant dense<0.000000e+00> : vector<8x32xf32>
    %165 = tpu.matmul %164, %19, %cst_53 {dimension_numbers = #tpu.dot_dimension_numbers<[1], [0], [0], [1], [0, 0, 1, 1], [], []>} : vector<8x64xf32>, vector<64x32xf32>, vector<8x32xf32> -> vector<8x32xf32>
    %166 = vector.shape_cast %10 : vector<32xf32> to vector<1x32xf32>
    %167 = vector.broadcast %166 : vector<1x32xf32> to vector<8x32xf32>
    %168 = arith.addf %165, %167 : vector<8x32xf32>
    %169 = arith.addf %158, %168 : vector<8x32xf32>
    %cst_54 = arith.constant dense<0.000000e+00> : vector<8xf32>
    %170 = vector.multi_reduction <add>, %169, %cst_54 [1] : vector<8x32xf32> to vector<8xf32>
    %171 = vector.shape_cast %170 : vector<8xf32> to vector<8x1xf32>
    %cst_55 = arith.constant 3.200000e+01 : f32
    %172 = vector.broadcast %cst_55 : f32 to vector<8x1xf32>
    %173 = arith.divf %171, %172 : vector<8x1xf32>
    %174 = vector.broadcast %173 : vector<8x1xf32> to vector<8x32xf32>
    %175 = arith.subf %169, %174 : vector<8x32xf32>
    %176 = arith.mulf %175, %175 : vector<8x32xf32>
    %cst_56 = arith.constant dense<0.000000e+00> : vector<8xf32>
    %177 = vector.multi_reduction <add>, %176, %cst_56 [1] : vector<8x32xf32> to vector<8xf32>
    %178 = vector.shape_cast %177 : vector<8xf32> to vector<8x1xf32>
    %cst_57 = arith.constant 3.200000e+01 : f32
    %179 = vector.broadcast %cst_57 : f32 to vector<8x1xf32>
    %180 = arith.divf %178, %179 : vector<8x1xf32>
    %cst_58 = arith.constant 9.99999974E-6 : f32
    %181 = vector.broadcast %cst_58 : f32 to vector<8x1xf32>
    %182 = arith.addf %180, %181 : vector<8x1xf32>
    %183 = math.rsqrt %182 : vector<8x1xf32>
    %184 = vector.broadcast %183 : vector<8x1xf32> to vector<8x32xf32>
    %185 = arith.mulf %175, %184 : vector<8x32xf32>
    %186 = vector.shape_cast %12 : vector<32xf32> to vector<1x32xf32>
    %187 = vector.broadcast %186 : vector<1x32xf32> to vector<8x32xf32>
    %188 = arith.mulf %185, %187 : vector<8x32xf32>
    %189 = vector.shape_cast %14 : vector<32xf32> to vector<1x32xf32>
    %190 = vector.broadcast %189 : vector<1x32xf32> to vector<8x32xf32>
    %191 = arith.addf %188, %190 : vector<8x32xf32>
    %c0_59 = arith.constant 0 : index
    %c1 = arith.constant 1 : index
    %c0_60 = arith.constant 0 : index
    %192 = vector.load %arg7[%c0_59, %c1, %c0_60] : memref<8x2x32xf32, #tpu.memory_space<vmem>>, vector<8x1x32xf32>
    %193 = vector.shape_cast %192 : vector<8x1x32xf32> to vector<8x32xf32>
    %194 = vector.shape_cast %191 : vector<8x32xf32> to vector<8x1x32xf32>
    tpu.vector_store %arg7[%c0_59, %c1, %c0_60], %194 {strides = array<i32>} : memref<8x2x32xf32, #tpu.memory_space<vmem>>, vector<8x1x32xf32>,
    return
  }
}

</mosaic_0001>

<bundles_post_ra>
// kernel: tpu_custom_call.1
= control target key start
LH: loop header
LB: loop body
LE: loop exit
PB: predicated region body
PF: predicated region fallthrough
CT: control target
= control target key end

     0   :  { %vm93_vm0 = vcmask 1041409   ;;  %vm96_vm1 = vcmask 1042434   ;;  %vm99_vm2 = vcmask 1043459   ;;  %vm102_vm3 = vcmask 1044484   ;;  %s2987_s0 = inlined_call_operand.vmem [shape: f32[8,2,32], index: 0, kind: input, shape index: {}]   ;;  %s2988_s1 = inlined_call_operand.vmem [shape: f32[4,32,24], index: 1, kind: input, shape index: {}]   ;;  %s2989_s2 = inlined_call_operand.vmem [shape: f32[4,1,24], index: 2, kind: input, shape index: {}]   ;;  %s2990_s3 = inlined_call_operand.vmem [shape: f32[4,8,32], index: 3, kind: input, shape index: {}]   ;;  %s2991_s4 = inlined_call_operand.vmem [shape: f32[32,64], index: 4, kind: input, shape index: {}]   ;;  %s2992_s5 = inlined_call_operand.vmem [shape: f32[64,32], index: 5, kind: input, shape index: {}]   ;;  %s2993_s6 = inlined_call_operand.vmem [shape: f32[8,128], index: 6, kind: input, shape index: {}]   ;;  %s2994_s7 = inlined_call_operand.hbm [shape: f32[8,2,32], index: 7, kind: output, shape index: {}]  }
   0x1   :  { %v2083_v0 = vld [vmem:[%s2988_s1 + $0x18] sm:$0xff]  ;;  %v2100_v3 = vld [vmem:[%s2988_s1 + $0x10] sm:$0xff]  ;;  %v2116_v6 = vld [vmem:[%s2988_s1 + $0x8] sm:$0xff]  ;;  %vm105_vm4 = vcmask 1045509   ;;  %vm108_vm5 = vcmask 1046534  }
   0x2   :  { %v2088_v1 = vld [vmem:[%s2988_s1 + $0x58] sm:$0xff]  ;;  %128 = vmatpush.msra.mxu1 %v2083_v0  ;;  %v2105_v4 = vld [vmem:[%s2988_s1 + $0x50] sm:$0xff]  ;;  %v2121_v7 = vld [vmem:[%s2988_s1 + $0x48] sm:$0xff] }
   0x3   :  { %v2093_v2 = vld [vmem:[%s2988_s1 + $0x78] sm:$0xff]  ;;  %168 = vmatpush.msra.mxu2 %v2088_v1  ;;  %v2110_v5 = vld [vmem:[%s2988_s1 + $0x70] sm:$0xff]  ;;  %v2126_v8 = vld [vmem:[%s2988_s1 + $0x68] sm:$0xff] }
   0x4   :  { %188 = vmatpush.msra.mxu3 %v2093_v2  ;;  %129 = vmatpush.msra.mxu1 %v2100_v3  ;;  %v2133_v9 = vld [vmem:[%s2988_s1] sm:$0xff]  ;;  %v2171_v16 = vld [vmem:[%s2987_s0 + $0x8] sm:$0x3]  ;;  %v2176_v17 = vld [vmem:[%s2987_s0 + $0xa] sm:$0x3] }
   0x5   :  { %169 = vmatpush.msra.mxu2 %v2105_v4  ;;  %v2138_v10 = vld [vmem:[%s2988_s1 + $0x40] sm:$0xff]  ;;  %v2182_v18 = vld [vmem:[%s2987_s0 + $0xc] sm:$0x3]  ;;  %v2191_v21 = vld [vmem:[%s2987_s0 + $0xe] sm:$0x3]  ;;  %v101_v23 = vrot.slane %v2171_v16, 4 }
   0x6   :  { %v2143_v11 = vld [vmem:[%s2988_s1 + $0x60] sm:$0xff]  ;;  %189 = vmatpush.msra.mxu3 %v2110_v5  ;;  %130 = vmatpush.msra.mxu1 %v2116_v6  ;;  %v2198_v24 = vld [vmem:[%s2988_s1 + $0x38] sm:$0xff]  ;;  %v2203_v25 = vld [vmem:[%s2988_s1 + $0x30] sm:$0xff]  ;;  %v104_v27 = vrot.slane %v2176_v17, 3  ;;  %v107_v29 = vrot.slane %v2182_v18, 2  ;;  %v110_v32 = vrot.slane %v2191_v21, 1 }
   0x7   :  { %v2149_v12 = vld [vmem:[%s2987_s0] sm:$0x3]  ;;  %v2154_v13 = vld [vmem:[%s2987_s0 + $0x2] sm:$0x3]  ;;  %v2159_v14 = vld [vmem:[%s2987_s0 + $0x4] sm:$0x3]  ;;  %170 = vmatpush.msra.mxu2 %v2121_v7 }
   0x8   :  { %v2166_v15 = vld [vmem:[%s2987_s0 + $0x6] sm:$0x3]  ;;  %190 = vmatpush.msra.mxu3 %v2126_v8  ;;  %v92_v19 = vrot.slane %v2154_v13, 7  ;;  %v95_v20 = vrot.slane %v2159_v14, 6  ;;  %131 = vmatpush.msra.mxu1 %v2133_v9  ;;  %v2215_v30 = vld [vmem:[%s2988_s1 + $0x28] sm:$0xff] }
   0x9   :  { %171 = vmatpush.msra.mxu2 %v2138_v10  ;;  %v98_v22 = vrot.slane %v2166_v15, 5 }
   0xa   :  { %191 = vmatpush.msra.mxu3 %v2143_v11  ;;  %v94_v26 = vsel %vm93_vm0, %v92_v19, %v2149_v12  ;;  %148 = vmatpush.msrb.mxu1 %v2198_v24 }
   0xb   :  { %v97_v28 = vsel %vm96_vm1, %v95_v20, %v94_v26 }
   0xc   :  { %v100_v31 = vsel %vm99_vm2, %v98_v22, %v97_v28  ;;  %149 = vmatpush.msrb.mxu1 %v2203_v25 }
   0xd   :  { %12 = vsyncpa [#allocation3], 0  ;;  %v103_v33 = vsel %vm102_vm3, %v101_v23, %v100_v31  ;;  %vm111_vm6 = vcmask 1047559   ;;  %v2224_v34 = vld [vmem:[%s2988_s1 + $0x20] sm:$0xff]  ;;  %vm113_vm7 = vcmask 261120   ;;  %s2034_s27 = smov 120  }
   0xe   :  { %v106_v35 = vsel %vm105_vm4, %v104_v27, %v103_v33  ;;  %150 = vmatpush.msrb.mxu1 %v2215_v30  ;;  %v2238_v38 = vld [vmem:[%s2989_s2] ss:$0 sm:$0xff]  ;;  %v2245_v41 = vld [vmem:[%s2989_s2 + $0x2] ss:$0 sm:$0xff]  ;;  %v2250_v42 = vld [vmem:[%s2989_s2 + $0x1] ss:$0 sm:$0xff] }
   0xf   :  { %v109_v36 = vsel %vm108_vm5, %v107_v29, %v106_v35  ;;  %v2258_v47 = vld [vmem:[%s2989_s2 + $0x3] ss:$0 sm:$0xff]  ;;  %vm199_vm8 = vcmask 64512   ;;  %s2035_s2 = smov 112   ;;  %vm771_vm13 = vcmask 523264   ;;  %vm958_vm14 = vcmask 253952  }
  0x10   :  { %v112_v37 = vsel %vm111_vm6, %v110_v32, %v109_v36  ;;  %151 = vmatpush.msrb.mxu1 %v2224_v34  ;;  %vm1466_vm15 = vcmask 261121   ;;  %s1867_s12 = sshll.u32 %s2994_s7, 4  ;;  %s2038_s13 = smov 32   ;;  %s1868_s12 = int_to_ptr.hbm [resolvable:$true] %s1867_s12 }
  0x11   :  { %1879 = vmatmul.msk.f32.vlgmr.msra.gmra.mxu1 %vm113_vm7, %v112_v37  ;;  %1881 = vmatmul.msk.f32.vlgmr.msra.gmra.mxu2 %vm113_vm7, %v112_v37  ;;  %s2039_s7 = smov 2  }
  0x12   :  { %1882 = vmatmul.msk.f32.vlgmr.msra.gmra.mxu3 %vm113_vm7, %v112_v37 }
  0x19   :  { %1880 = vmatmul.msk.f32.vlgmr.msrb.gmra.mxu1 %vm113_vm7, %v112_v37 }
  0x8e   :  { %v133_v39 = vpop.f32.mrf.mxu1 }
  0x8f   :  { %v134_v40 = vadd.f32 %v2238_v38, %v133_v39 }
  0x91   :  { %197 = vrot.lane.b32.xlu1 %v134_v40, %s2034_s27 }
  0x94   :  { %v173_v43 = vpop.f32.mrf.mxu2 }
  0x95   :  { %v174_v44 = vadd.f32 %v2245_v41, %v173_v43  ;;  %v193_v48 = vpop.f32.mrf.mxu3 }
  0x96   :  { %v153_v45 = vpop.f32.mrf.mxu1  ;;  %v194_v49 = vadd.f32 %v2258_v47, %v193_v48 }
  0x97   :  { %v154_v46 = vadd.f32 %v2250_v42, %v153_v45  ;;  %252 = vrot.lane.b32.xlu0 %v174_v44, %s2034_s27 }
  0x98   :  { %v1929_v63 = vpack.i.bf16 %v194_v49, %v174_v44 }
  0x99   :  { %225 = vrot.lane.b32.xlu1 %v154_v46, %s2034_s27  ;;  %v1934_v62 = vpack.i.bf16 %v154_v46, %v134_v40 }
  0x9f   :  { %279 = vrot.lane.b32.xlu0 %v194_v49, %s2034_s27 }
 0x103   :  { %v198_v50 = vpop.permute.xlu1 %197 }
 0x104   :  { %1883 = vmatpush.xpose.msk.msra.mxu0 %vm199_vm8, %v198_v50 }
 0x107   :  { %1884 = vmatmul.msk.f32.vlgmr.msra.gmra.mxu0 %vm199_vm8, %v134_v40 }
 0x109   :  { %v253_v51 = vpop.permute.xlu0 %252 }
 0x10a   :  { %1887 = vmatpush.xpose.msk.msrb.mxu2 %vm199_vm8, %v253_v51 }
 0x10b   :  { %v226_v52 = vpop.permute.xlu1 %225 }
 0x10c   :  { %1885 = vmatpush.xpose.msk.msra.mxu1 %vm199_vm8, %v226_v52 }
 0x10d   :  { %1888 = vmatmul.msk.f32.vlgmr.msrb.gmra.mxu2 %vm199_vm8, %v174_v44 }
 0x10f   :  { %1886 = vmatmul.msk.f32.vlgmr.msra.gmra.mxu1 %vm199_vm8, %v154_v46 }
 0x111   :  { %v280_v53 = vpop.permute.xlu0 %279 }
 0x112   :  { %1889 = vmatpush.xpose.msk.msrb.mxu3 %vm199_vm8, %v280_v53 }
 0x115   :  { %1890 = vmatmul.msk.f32.vlgmr.msrb.gmra.mxu3 %vm199_vm8, %v194_v49 }
 0x184   :  { %v221_v54 = vpop.f32.mrf.mxu0 }
 0x185   :  { %v305_v55 = vsel %vm199_vm8, %v221_v54, -inf }
 0x186   :  { %306 = vmax.xlane.f32.xlu0 %v305_v55 }
 0x18c   :  { %v248_v56 = vpop.f32.mrf.mxu1 }
 0x18d   :  { %v308_v57 = vsel %vm199_vm8, %v248_v56, -inf }
 0x18e   :  { %309 = vmax.xlane.f32.xlu1 %v308_v57 }
 0x190   :  { %v275_v58 = vpop.f32.mrf.mxu2 }
 0x191   :  { %v311_v59 = vsel %vm199_vm8, %v275_v58, -inf }
 0x192   :  { %312 = vmax.xlane.f32.xlu2 %v311_v59 }
 0x198   :  { %v302_v60 = vpop.f32.mrf.mxu3 }
 0x199   :  { %v314_v61 = vsel %vm199_vm8, %v302_v60, -inf }
 0x19a   :  { %315 = vmax.xlane.f32.xlu2 %v314_v61 }
 0x1a7   :  { %1935 = vrot.lane.b32.xlu1 %v1934_v62, %s2035_s2 }
 0x1b2   :  { %1930 = vrot.lane.b32.xlu2 %v1929_v63, %s2035_s2 }
 0x1f9   :  { %v307_v29 = vpop.xlane.xlu0 %306 }
 0x1fa   :  { %v317_v36 = vsub.f32 %v221_v54, %v307_v29  ;;  %v979_v29 = vrot.slane %v2191_v21, 2 }
 0x1fc   :  { %v321_v40 = vmul.f32 1.442695, %v317_v36 }
 0x201   :  { %v310_v19 = vpop.xlane.xlu1 %309 }
 0x202   :  { %v318_v20 = vsub.f32 %v248_v56, %v310_v19 }
 0x204   :  { %v323_v22 = vmul.f32 1.442695, %v318_v20 }
 0x205   :  { %v313_v23 = vpop.xlane.xlu2 %312 }
 0x206   :  { %1953 = vpow2.f32 %v323_v22  ;;  %v319_v26 = vsub.f32 %v275_v58, %v313_v23  ;;  %v2288_v22 = vld [vmem:[%s2990_s3 + $0x8] sm:$0xff]  ;;  %v2294_v23 = vld [vmem:[%s2990_s3 + $0x10] sm:$0xff] }
 0x208   :  { %v325_v27 = vmul.f32 1.442695, %v319_v26  ;;  %v2300_v26 = vld [vmem:[%s2990_s3 + $0x18] sm:$0xff] }
 0x20a   :  { %1955 = vpow2.f32 %v325_v27  ;;  %v2312_v27 = vld [vmem:[%s2990_s3] sm:$0xff] }
 0x20c   :  { %v1954_v28 = vpop.eup %1953 }
 0x20d   :  { %v316_v31 = vpop.xlane.xlu2 %315  ;;  %v332_v32 = vsel %vm199_vm8, %v1954_v28, 0.0 }
 0x20e   :  { %v320_v33 = vsub.f32 %v302_v60, %v316_v31  ;;  %333 = vadd.xlane.f32.xlu0 %v332_v32 }
 0x210   :  { %v1956_v35 = vpop.eup %1955  ;;  %v327_v37 = vmul.f32 1.442695, %v320_v33 }
 0x211   :  { %v335_v39 = vsel %vm199_vm8, %v1956_v35, 0.0 }
 0x212   :  { %1957 = vpow2.f32 %v327_v37  ;;  %336 = vadd.xlane.f32.xlu2 %v335_v39 }
 0x213   :  { %1959 = vpow2.f32 %v321_v40 }
 0x215   :  { %v1931_v43 = vpop.permute.xlu2 %1930 }
 0x216   :  { %v1933_v44 = vunpack.i.h.bf16 %v1931_v43  ;;  %v1932_v45 = vunpack.i.l.bf16 %v1931_v43 }
 0x218   :  { %v1958_v46 = vpop.eup %1957  ;;  %422 = vmatpush.msra.mxu2 %v1932_v45  ;;  %448 = vmatpush.msra.mxu3 %v1933_v44  ;;  %v2353_v44 = vld [vmem:[%s2993_s6] sm:$0xff] }
 0x219   :  { %v1936_v48 = vpop.permute.xlu1 %1935  ;;  %v338_v49 = vsel %vm199_vm8, %v1958_v46, 0.0  ;;  %v1960_v52 = vpop.eup %1959 }
 0x21a   :  { %v1938_v50 = vunpack.i.h.bf16 %v1936_v48  ;;  %339 = vadd.xlane.f32.xlu2 %v338_v49  ;;  %v1937_v51 = vunpack.i.l.bf16 %v1936_v48  ;;  %v329_v53 = vsel %vm199_vm8, %v1960_v52, 0.0  ;;  %517 = vmatpush.msrb.mxu2 %v2294_v23 }
 0x21b   :  { %540 = vmatpush.msrb.mxu3 %v2300_v26 }
 0x21c   :  { %370 = vmatpush.msrb.mxu0 %v1937_v51  ;;  %396 = vmatpush.msrb.mxu1 %v1938_v50  ;;  %v552_v50 = vperm.slane %v2353_v44, 0 }
 0x21e   :  { %494 = vmatpush.msra.mxu1 %v2288_v22  ;;  %471 = vmatpush.msra.mxu0 %v2312_v27 }
 0x222   :  { %330 = vadd.xlane.f32.xlu2 %v329_v53 }
 0x281   :  { %v334_v54 = vpop.xlane.xlu0 %333 }
 0x282   :  { %1961 = vrcp.f32 %v334_v54 }
 0x285   :  { %v337_v55 = vpop.xlane.xlu2 %336 }
 0x286   :  { %1963 = vrcp.f32 %v337_v55 }
 0x288   :  { %v1962_v56 = vpop.eup %1961 }
 0x289   :  { %v346_v57 = vmul.f32 %v1962_v56, %v1954_v28 }
 0x28b   :  { %1892 = vmatmul.msk.f32.vlgmr.msrb.gmra.mxu1 %vm199_vm8, %v346_v57 }
 0x28c   :  { %v1964_v58 = vpop.eup %1963 }
 0x28d   :  { %v347_v59 = vmul.f32 %v1964_v58, %v1956_v35  ;;  %v340_v60 = vpop.xlane.xlu2 %339 }
 0x28e   :  { %1965 = vrcp.f32 %v340_v60 }
 0x28f   :  { %1893 = vmatmul.msk.f32.vlgmr.msra.gmra.mxu2 %vm199_vm8, %v347_v59 }
 0x290   :  { %995 = vmatpush.msra.mxu2 %v2083_v0 }
 0x292   :  { %996 = vmatpush.msra.mxu2 %v2100_v3 }
 0x294   :  { %v1966_v61 = vpop.eup %1965  ;;  %997 = vmatpush.msra.mxu2 %v2116_v6 }
 0x295   :  { %v348_v62 = vmul.f32 %v1966_v61, %v1958_v46  ;;  %v331_v63 = vpop.xlane.xlu2 %330 }
 0x296   :  { %1967 = vrcp.f32 %v331_v63  ;;  %998 = vmatpush.msra.mxu2 %v2133_v9 }
 0x297   :  { %1894 = vmatmul.msk.f32.vlgmr.msra.gmra.mxu3 %vm199_vm8, %v348_v62 }
 0x298   :  { %1015 = vmatpush.msra.mxu3 %v2198_v24  ;;  %v967_v24 = vrot.slane %v2149_v12, 1 }
 0x29a   :  { %1016 = vmatpush.msra.mxu3 %v2203_v25  ;;  %v969_v25 = vrot.slane %v2159_v14, 7 }
 0x29c   :  { %v1968_v19 = vpop.eup %1967  ;;  %1017 = vmatpush.msra.mxu3 %v2215_v30  ;;  %v968_v30 = vsel %vm93_vm0, %v2154_v13, %v967_v24 }
 0x29d   :  { %v345_v20 = vmul.f32 %v1968_v19, %v1960_v52 }
 0x29e   :  { %1018 = vmatpush.msra.mxu3 %v2224_v34  ;;  %v977_v34 = vrot.slane %v2182_v18, 3 }
 0x29f   :  { %1891 = vmatmul.msk.f32.vlgmr.msrb.gmra.mxu0 %vm199_vm8, %v345_v20 }
 0x308   :  { %v398_v0 = vpop.f32.mrf.mxu1 }
 0x309   :  { %1896 = vmatmul.msk.f32.vlgmr.msra.gmra.mxu1 %vm199_vm8, %v398_v0 }
 0x312   :  { %v424_v3 = vpop.f32.mrf.mxu2 }
 0x313   :  { %1897 = vmatmul.msk.f32.vlgmr.msrb.gmra.mxu2 %vm199_vm8, %v424_v3 }
 0x314   :  { %1055 = vmatpush.msrb.mxu2 %v2093_v2  ;;  %v971_v2 = vrot.slane %v2166_v15, 6 }
 0x316   :  { %1056 = vmatpush.msrb.mxu2 %v2110_v5  ;;  %v973_v5 = vrot.slane %v2171_v16, 5 }
 0x318   :  { %1057 = vmatpush.msrb.mxu2 %v2126_v8  ;;  %v975_v8 = vrot.slane %v2176_v17, 4 }
 0x31a   :  { %v450_v6 = vpop.f32.mrf.mxu3  ;;  %1058 = vmatpush.msrb.mxu2 %v2143_v11  ;;  %v970_v11 = vsel %vm96_vm1, %v969_v25, %v968_v30 }
 0x31b   :  { %1898 = vmatmul.msk.f32.vlgmr.msrb.gmra.mxu3 %vm199_vm8, %v450_v6  ;;  %v972_v28 = vsel %vm99_vm2, %v971_v2, %v970_v11  ;;  %v2036_v11 = vmov 32.0  }
 0x31c   :  { %v372_v9 = vpop.f32.mrf.mxu0  ;;  %v974_v31 = vsel %vm102_vm3, %v973_v5, %v972_v28  ;;  %1969 = vrcp.f32 %v2036_v11 }
 0x31d   :  { %1895 = vmatmul.msk.f32.vlgmr.msra.gmra.mxu0 %vm199_vm8, %v372_v9  ;;  %v976_v32 = vsel %vm105_vm4, %v975_v8, %v974_v31 }
 0x31e   :  { %v978_v33 = vsel %vm108_vm5, %v977_v34, %v976_v32 }
 0x31f   :  { %v2340_v35 = vsel %vm111_vm6, %v979_v29, %v978_v33 }
 0x320   :  { %1901 = vmatmul.msk.f32.vlgmr.msra.gmra.mxu2 %vm113_vm7, %v2340_v35 }
 0x322   :  { %v1970_v28 = vpop.eup %1969 }
 0x323   :  { %1902 = vmatmul.msk.f32.vlgmr.msra.gmra.mxu3 %vm113_vm7, %v2340_v35  ;;  %v605_v29 = vmul.f32 32.0, %v1970_v28  ;;  %vm609_vm9 = vweird.f32 %v1970_v28 }
 0x325   :  { %v606_v33 = vsub.f32 1.0, %v605_v29 }
 0x328   :  { %1904 = vmatmul.msk.f32.vlgmr.msrb.gmra.mxu2 %vm113_vm7, %v2340_v35 }
 0x386   :  { %v496_v36 = vpop.f32.mrf.mxu1 }
 0x387   :  { %v546_v40 = vsel %vm113_vm7, %v496_v36, 0.0  ;;  %v607_v36 = vmul.f32 %v1970_v28, %v606_v33  ;;  %v2445_v33 = vld [vmem:[%s2991_s4 + $0x10] sm:$0xff] }
 0x396   :  { %v519_v37 = vpop.f32.mrf.mxu2 }
 0x397   :  { %v548_v46 = vsel %vm113_vm7, %v519_v37, 0.0  ;;  %v608_v37 = vadd.f32 %v1970_v28, %v607_v36 }
 0x39a   :  { %v473_v39 = vpop.f32.mrf.mxu0 }
 0x39b   :  { %v545_v43 = vsel %vm113_vm7, %v473_v39, 0.0  ;;  %v2381_v39 = vsel %vm609_vm9, %v1970_v28, %v608_v37 }
 0x39c   :  { %v547_v45 = vadd.f32 %v546_v40, %v545_v43 }
 0x39e   :  { %v542_v48 = vpop.f32.mrf.mxu3  ;;  %v549_v49 = vadd.f32 %v548_v46, %v547_v45 }
 0x39f   :  { %v550_v51 = vsel %vm113_vm7, %v542_v48, 0.0 }
 0x3a0   :  { %v551_v52 = vadd.f32 %v550_v51, %v549_v49 }
 0x3a2   :  { %v553_v53 = vadd.f32 %v552_v50, %v551_v52 }
 0x3a3   :  { %v1000_v34 = vpop.f32.mrf.mxu2 }
 0x3a4   :  { %v555_v54 = vrot.slane %v553_v53, 1  ;;  %v556_v55 = vrot.slane %v553_v53, 2  ;;  %v557_v56 = vrot.slane %v553_v53, 3  ;;  %v558_v57 = vrot.slane %v553_v53, 4 }
 0x3a5   :  { %v559_v58 = vrot.slane %v553_v53, 5  ;;  %v560_v59 = vrot.slane %v553_v53, 6  ;;  %v561_v60 = vrot.slane %v553_v53, 7  ;;  %v570_v20 = vadd.f32 %v553_v53, %v2149_v12 }
 0x3a6   :  { %v571_v61 = vadd.f32 %v555_v54, %v2154_v13  ;;  %v572_v62 = vadd.f32 %v556_v55, %v2159_v14  ;;  %v573_v63 = vadd.f32 %v557_v56, %v2166_v15  ;;  %v574_v19 = vadd.f32 %v558_v57, %v2171_v16 }
 0x3a7   :  { %v575_v0 = vadd.f32 %v559_v58, %v2176_v17  ;;  %v576_v9 = vadd.f32 %v560_v59, %v2182_v18  ;;  %v577_v24 = vadd.f32 %v561_v60, %v2191_v21  ;;  %v2430_v28 = vadd.f32 %v2238_v38, %v1000_v34  ;;  %v2451_v38 = vld [vmem:[%s2991_s4 + $0x8] sm:$0xff]  ;;  %v2457_v34 = vld [vmem:[%s2991_s4] sm:$0xff] }
 0x3a8   :  { %v586_v3 = vrot.slane %v571_v61, 7  ;;  %v588_v6 = vrot.slane %v572_v62, 6  ;;  %v590_v30 = vrot.slane %v573_v63, 5  ;;  %v592_v14 = vrot.slane %v574_v19, 4 }
 0x3a9   :  { %v594_v2 = vrot.slane %v575_v0, 3  ;;  %v596_v12 = vrot.slane %v576_v9, 2  ;;  %v598_v5 = vrot.slane %v577_v24, 1 }
 0x3aa   :  { %v587_v25 = vsel %vm93_vm0, %v586_v3, %v570_v20 }
 0x3ab   :  { %v589_v13 = vsel %vm96_vm1, %v588_v6, %v587_v25  ;;  %v1060_v31 = vpop.f32.mrf.mxu2 }
 0x3ac   :  { %v591_v15 = vsel %vm99_vm2, %v590_v30, %v589_v13  ;;  %v2377_v32 = vadd.f32 %v2258_v47, %v1060_v31  ;;  %v2440_v31 = vld [vmem:[%s2991_s4 + $0x18] sm:$0xff] }
 0x3ad   :  { %v593_v16 = vsel %vm102_vm3, %v592_v14, %v591_v15  ;;  %761 = vmatpush.msrb.mxu0 %v2440_v31 }
 0x3ae   :  { %v595_v17 = vsel %vm105_vm4, %v594_v2, %v593_v16  ;;  %1145 = vrot.lane.b32.xlu1 %v2377_v32, %s2034_s27 }
 0x3af   :  { %v597_v8 = vsel %vm108_vm5, %v596_v12, %v595_v17  ;;  %762 = vmatpush.msrb.mxu0 %v2445_v33 }
 0x3b0   :  { %v599_v18 = vsel %vm111_vm6, %v598_v5, %v597_v8 }
 0x3b1   :  { %v601_v21 = vsel %vm113_vm7, %v599_v18, 0.0  ;;  %763 = vmatpush.msrb.mxu0 %v2451_v38 }
 0x3b2   :  { %602 = vadd.xlane.f32.xlu0 %v601_v21 }
 0x3b3   :  { %764 = vmatpush.msrb.mxu0 %v2457_v34 }
 0x3b5   :  { %1035 = vmatpush.msra.mxu0 %v2088_v1  ;;  %v2468_v1 = vperm.slane %v2353_v44, 1 }
 0x3b7   :  { %1036 = vmatpush.msra.mxu0 %v2105_v4  ;;  %v2471_v4 = vperm.slane %v2353_v44, 2 }
 0x3b9   :  { %1037 = vmatpush.msra.mxu0 %v2121_v7 }
 0x3bb   :  { %1038 = vmatpush.msra.mxu0 %v2138_v10 }
 0x420   :  { %v1146_v29 = vpop.permute.xlu1 %1145 }
 0x421   :  { %1911 = vmatpush.xpose.msk.msra.mxu2 %vm199_vm8, %v1146_v29 }
 0x424   :  { %1912 = vmatmul.msk.f32.vlgmr.msra.gmra.mxu2 %vm199_vm8, %v2377_v32 }
 0x425   :  { %v603_v40 = vpop.xlane.xlu0 %602 }
 0x426   :  { %v611_v43 = vmul.f32 %v2381_v39, %v603_v40 }
 0x428   :  { %v613_v45 = vrot.slane %v611_v43, 1  ;;  %v614_v46 = vrot.slane %v611_v43, 2  ;;  %v615_v48 = vrot.slane %v611_v43, 3  ;;  %v616_v49 = vrot.slane %v611_v43, 4 }
 0x429   :  { %v617_v51 = vrot.slane %v611_v43, 5  ;;  %v618_v52 = vrot.slane %v611_v43, 6  ;;  %v619_v47 = vrot.slane %v611_v43, 7  ;;  %v2384_v53 = vsub.f32 %v570_v20, %v611_v43 }
 0x42a   :  { %v2386_v54 = vsub.f32 %v571_v61, %v613_v45  ;;  %v2388_v55 = vsub.f32 %v572_v62, %v614_v46  ;;  %v2390_v56 = vsub.f32 %v573_v63, %v615_v48  ;;  %v2392_v57 = vsub.f32 %v574_v19, %v616_v49  ;;  %v1020_v62 = vpop.f32.mrf.mxu3 }
 0x42b   :  { %v2394_v58 = vsub.f32 %v575_v0, %v617_v51  ;;  %v2396_v59 = vsub.f32 %v576_v9, %v618_v52  ;;  %v2398_v60 = vsub.f32 %v577_v24, %v619_v47  ;;  %v2409_v19 = vadd.f32 %v2250_v42, %v1020_v62 }
 0x42c   :  { %v637_v3 = vmul.f32 %v2386_v54, %v2386_v54  ;;  %v638_v20 = vmul.f32 %v2388_v55, %v2388_v55  ;;  %v639_v61 = vmul.f32 %v2390_v56, %v2390_v56  ;;  %v640_v63 = vmul.f32 %v2392_v57, %v2392_v57 }
 0x42d   :  { %v636_v0 = vmul.f32 %v2384_v53, %v2384_v53  ;;  %v641_v6 = vmul.f32 %v2394_v58, %v2394_v58  ;;  %v642_v25 = vmul.f32 %v2396_v59, %v2396_v59  ;;  %1091 = vrot.lane.b32.xlu1 %v2409_v19, %s2034_s27  ;;  %v643_v30 = vmul.f32 %v2398_v60, %v2398_v60 }
 0x42e   :  { %v652_v9 = vrot.slane %v637_v3, 7  ;;  %v654_v24 = vrot.slane %v638_v20, 6  ;;  %v656_v13 = vrot.slane %v639_v61, 5  ;;  %v658_v15 = vrot.slane %v640_v63, 4 }
 0x42f   :  { %v660_v16 = vrot.slane %v641_v6, 3  ;;  %v662_v17 = vrot.slane %v642_v25, 2  ;;  %v664_v8 = vrot.slane %v643_v30, 1 }
 0x430   :  { %v653_v42 = vsel %vm93_vm0, %v652_v9, %v636_v0 }
 0x431   :  { %v655_v14 = vsel %vm96_vm1, %v654_v24, %v653_v42 }
 0x432   :  { %v657_v2 = vsel %vm99_vm2, %v656_v13, %v655_v14 }
 0x433   :  { %v659_v12 = vsel %vm102_vm3, %v658_v15, %v657_v2 }
 0x434   :  { %v661_v5 = vsel %vm105_vm4, %v660_v16, %v659_v12 }
 0x435   :  { %v663_v18 = vsel %vm108_vm5, %v662_v17, %v661_v5 }
 0x436   :  { %v665_v21 = vsel %vm111_vm6, %v664_v8, %v663_v18 }
 0x437   :  { %v667_v11 = vsel %vm113_vm7, %v665_v21, 0.0 }
 0x438   :  { %668 = vadd.xlane.f32.xlu0 %v667_v11 }
 0x44c   :  { %1064 = vrot.lane.b32.xlu0 %v2430_v28, %s2034_s27 }
 0x4ab   :  { %v669_v36 = vpop.xlane.xlu0 %668 }
 0x4ac   :  { %v670_v37 = vmul.f32 %v669_v36, %v2381_v39 }
 0x4ae   :  { %v671_v40 = vadd.f32 1e-05, %v670_v37 }
 0x4b0   :  { %1971 = vrsqrt.f32 %v671_v40  ;;  %vm678_vm11 = vweird.f32 %v671_v40 }
 0x4b6   :  { %v1972_v43 = vpop.eup %1971 }
 0x4b7   :  { %v673_v45 = vmul.f32 %v1972_v43, %v671_v40  ;;  %vm679_vm10 = vweird.f32 %v1972_v43 }
 0x4b8   :  { %vm680_vm12 = vmor %vm678_vm11, %vm679_vm10 }
 0x4b9   :  { %v674_v46 = vmul.f32 %v1972_v43, %v673_v45 }
 0x4bb   :  { %v675_v48 = vmul.f32 0.5, %v674_v46 }
 0x4bd   :  { %v676_v49 = vsub.f32 1.5, %v675_v48 }
 0x4be   :  { %v1065_v51 = vpop.permute.xlu0 %1064 }
 0x4bf   :  { %v677_v52 = vmul.f32 %v1972_v43, %v676_v49  ;;  %1905 = vmatpush.xpose.msk.msrb.mxu3 %vm199_vm8, %v1065_v51 }
 0x4c1   :  { %v681_v7 = vsel %vm680_vm12, %v1972_v43, %v677_v52  ;;  %v1092_v52 = vpop.permute.xlu1 %1091 }
 0x4c2   :  { %v683_v10 = vrot.slane %v681_v7, 1  ;;  %v684_v47 = vrot.slane %v681_v7, 2  ;;  %v685_v3 = vrot.slane %v681_v7, 3  ;;  %v686_v20 = vrot.slane %v681_v7, 4  ;;  %1906 = vmatmul.msk.f32.vlgmr.msrb.gmra.mxu3 %vm199_vm8, %v2430_v28 }
 0x4c3   :  { %v698_v61 = vmul.f32 %v681_v7, %v2384_v53  ;;  %v687_v62 = vrot.slane %v681_v7, 5  ;;  %v688_v63 = vrot.slane %v681_v7, 6  ;;  %v689_v0 = vrot.slane %v681_v7, 7 }
 0x4c4   :  { %v699_v6 = vmul.f32 %v683_v10, %v2386_v54  ;;  %v700_v9 = vmul.f32 %v684_v47, %v2388_v55  ;;  %v701_v24 = vmul.f32 %v685_v3, %v2390_v56  ;;  %v702_v25 = vmul.f32 %v686_v20, %v2392_v57  ;;  %v1168_v10 = vpop.f32.mrf.mxu2  ;;  %v2540_v3 = vld [vmem:[%s2992_s5 + $0x38] sm:$0xff]  ;;  %v2546_v20 = vld [vmem:[%s2992_s5 + $0x30] sm:$0xff] }
 0x4c5   :  { %v703_v30 = vmul.f32 %v687_v62, %v2394_v58  ;;  %v704_v42 = vmul.f32 %v688_v63, %v2396_v59  ;;  %v705_v13 = vmul.f32 %v689_v0, %v2398_v60  ;;  %v707_v14 = vmul.f32 %v2468_v1, %v698_v61  ;;  %783 = vmatpush.msrb.mxu1 %v2540_v3  ;;  %v2557_v61 = vld [vmem:[%s2992_s5 + $0x20] sm:$0xff]  ;;  %v2563_v62 = vld [vmem:[%s2992_s5 + $0x18] sm:$0xff]  ;;  %v2570_v63 = vld [vmem:[%s2992_s5 + $0x10] sm:$0xff] }
 0x4c6   :  { %v708_v53 = vmul.f32 %v2468_v1, %v699_v6  ;;  %v709_v15 = vmul.f32 %v2468_v1, %v700_v9  ;;  %v710_v54 = vmul.f32 %v2468_v1, %v701_v24  ;;  %v711_v55 = vmul.f32 %v2468_v1, %v702_v25  ;;  %v2576_v0 = vld [vmem:[%s2992_s5 + $0x8] sm:$0xff]  ;;  %v2582_v6 = vld [vmem:[%s2992_s5] sm:$0xff] }
 0x4c7   :  { %v712_v56 = vmul.f32 %v2468_v1, %v703_v30  ;;  %v713_v57 = vmul.f32 %v2468_v1, %v704_v42  ;;  %v714_v58 = vmul.f32 %v2468_v1, %v705_v13  ;;  %v2504_v12 = vadd.f32 %v2471_v4, %v707_v14  ;;  %784 = vmatpush.msrb.mxu1 %v2546_v20 }
 0x4c8   :  { %v2492_v59 = vadd.f32 %v2471_v4, %v708_v53  ;;  %v2495_v60 = vadd.f32 %v2471_v4, %v709_v15  ;;  %v2498_v2 = vadd.f32 %v2471_v4, %v710_v54  ;;  %v2501_v16 = vadd.f32 %v2471_v4, %v711_v55 }
 0x4c9   :  { %v2507_v17 = vadd.f32 %v2471_v4, %v712_v56  ;;  %v2512_v18 = vadd.f32 %v2471_v4, %v713_v57  ;;  %v2515_v21 = vadd.f32 %v2471_v4, %v714_v58  ;;  %v1180_v47 = vsel %vm199_vm8, %v1168_v10, -inf }
 0x4ca   :  { %v733_v5 = vrot.slane %v2492_v59, 7  ;;  %v735_v8 = vrot.slane %v2495_v60, 6  ;;  %v737_v29 = vrot.slane %v2498_v2, 5  ;;  %v739_v37 = vrot.slane %v2501_v16, 4  ;;  %1181 = vmax.xlane.f32.xlu0 %v1180_v47 }
 0x4cb   :  { %v741_v43 = vrot.slane %v2507_v17, 3  ;;  %v743_v46 = vrot.slane %v2512_v18, 2  ;;  %v745_v49 = vrot.slane %v2515_v21, 1  ;;  %v724_v25 = vperm.slane %v2353_v44, 3 }
 0x4cc   :  { %v734_v11 = vsel %vm93_vm0, %v733_v5, %v2504_v12 }
 0x4cd   :  { %v736_v36 = vsel %vm96_vm1, %v735_v8, %v734_v11 }
 0x4ce   :  { %v738_v40 = vsel %vm99_vm2, %v737_v29, %v736_v36 }
 0x4cf   :  { %v740_v45 = vsel %vm102_vm3, %v739_v37, %v738_v40 }
 0x4d0   :  { %v742_v48 = vsel %vm105_vm4, %v741_v43, %v740_v45 }
 0x4d1   :  { %v744_v51 = vsel %vm108_vm5, %v743_v46, %v742_v48 }
 0x4d2   :  { %v746_v7 = vsel %vm111_vm6, %v745_v49, %v744_v51 }
 0x4d3   :  { %1899 = vmatmul.msk.f32.vlgmr.msrb.gmra.mxu0 %vm113_vm7, %v746_v7 }
 0x4d4   :  { %1907 = vmatpush.xpose.msk.msrb.mxu0 %vm199_vm8, %v1092_v52 }
 0x4db   :  { %1903 = vmatmul.msk.f32.vlgmr.msra.gmra.mxu0 %vm113_vm7, %v2340_v35  ;;  %v2551_v35 = vld [vmem:[%s2992_s5 + $0x28] sm:$0xff] }
 0x4dc   :  { %785 = vmatpush.msrb.mxu1 %v2551_v35 }
 0x4de   :  { %786 = vmatpush.msrb.mxu1 %v2557_v61 }
 0x4e0   :  { %787 = vmatpush.msrb.mxu1 %v2563_v62 }
 0x4e2   :  { %788 = vmatpush.msrb.mxu1 %v2570_v63 }
 0x4e3   :  { %1908 = vmatmul.msk.f32.vlgmr.msrb.gmra.mxu0 %vm199_vm8, %v2409_v19 }
 0x4e4   :  { %789 = vmatpush.msrb.mxu1 %v2576_v0 }
 0x4e6   :  { %790 = vmatpush.msrb.mxu1 %v2582_v6 }
 0x53d   :  { %v1182_v11 = vpop.xlane.xlu0 %1181 }
 0x53e   :  { %v1186_v29 = vsub.f32 %v1168_v10, %v1182_v11 }
 0x540   :  { %v1193_v37 = vmul.f32 1.442695, %v1186_v29 }
 0x545   :  { %v1087_v9 = vpop.f32.mrf.mxu3 }
 0x546   :  { %v1171_v24 = vsel %vm199_vm8, %v1087_v9, -inf }
 0x547   :  { %1172 = vmax.xlane.f32.xlu1 %v1171_v24 }
 0x550   :  { %v766_v30 = vpop.f32.mrf.mxu0 }
 0x551   :  { %v767_v42 = vadd.f32 %v766_v30, %v724_v25 }
 0x553   :  { %v769_v13 = vmax.f32 %v767_v42, 0.0  ;;  %v770_v42 = vperm.slane %v2353_v44, 4 }
 0x555   :  { %1900 = vmatmul.msk.f32.vlgmr.msrb.gmra.mxu1 %vm771_vm13, %v769_v13 }
 0x558   :  { %v1040_v14 = vpop.f32.mrf.mxu0 }
 0x559   :  { %v1041_v53 = vadd.f32 %v2245_v41, %v1040_v14  ;;  %v1939_v41 = vpack.i.bf16 %v2377_v32, %v2430_v28 }
 0x55b   :  { %1118 = vrot.lane.b32.xlu2 %v1041_v53, %s2034_s27  ;;  %v1944_v30 = vpack.i.bf16 %v1041_v53, %v2409_v19 }
 0x560   :  { %v1114_v15 = vpop.f32.mrf.mxu0 }
 0x561   :  { %v1174_v54 = vsel %vm199_vm8, %v1114_v15, -inf }
 0x584   :  { %1175 = vmax.xlane.f32.xlu2 %v1174_v54 }
 0x5b5   :  { %v1119_v55 = vpop.permute.xlu2 %1118 }
 0x5b6   :  { %1909 = vmatpush.xpose.msk.msra.mxu1 %vm199_vm8, %v1119_v55 }
 0x5b9   :  { %1910 = vmatmul.msk.f32.vlgmr.msra.gmra.mxu1 %vm199_vm8, %v1041_v53 }
 0x5ba   :  { %v1173_v56 = vpop.xlane.xlu1 %1172 }
 0x5bb   :  { %v1183_v57 = vsub.f32 %v1087_v9, %v1173_v56 }
 0x5bd   :  { %v1187_v58 = vmul.f32 1.442695, %v1183_v57 }
 0x5bf   :  { %1973 = vpow2.f32 %v1187_v58 }
 0x5c0   :  { %1975 = vpow2.f32 %v1193_v37 }
 0x5c5   :  { %v1974_v5 = vpop.eup %1973 }
 0x5c6   :  { %v1195_v8 = vsel %vm199_vm8, %v1974_v5, 0.0  ;;  %v2603_v49 = vpop.eup %1975 }
 0x5c7   :  { %1196 = vadd.xlane.f32.xlu0 %v1195_v8  ;;  %v1204_v32 = vsel %vm199_vm8, %v2603_v49, 0.0 }
 0x5d2   :  { %v792_v36 = vpop.f32.mrf.mxu1 }
 0x5d3   :  { %v793_v13 = vadd.f32 %v792_v36, %v770_v42 }
 0x5d5   :  { %v797_v14 = vrot.slane %v793_v13, 2  ;;  %v2631_v19 = vadd.f32 %v793_v13, %v2504_v12  ;;  %v801_v57 = vrot.slane %v793_v13, 6 }
 0x5d7   :  { %v2650_v8 = vadd.f32 %v801_v57, %v2512_v18 }
 0x5db   :  { %1940 = vrot.lane.b32.xlu0 %v1939_v41, %s2035_s2 }
 0x5f7   :  { %v1176_v40 = vpop.xlane.xlu2 %1175 }
 0x5f8   :  { %v1184_v43 = vsub.f32 %v1114_v15, %v1176_v40 }
 0x5fa   :  { %v1189_v48 = vmul.f32 1.442695, %v1184_v43 }
 0x5fc   :  { %1977 = vpow2.f32 %v1189_v48 }
 0x602   :  { %v2607_v51 = vpop.eup %1977 }
 0x603   :  { %v1198_v52 = vsel %vm199_vm8, %v2607_v51, 0.0 }
 0x636   :  { %v2599_v45 = vpop.f32.mrf.mxu1 }
 0x637   :  { %v1177_v46 = vsel %vm199_vm8, %v2599_v45, -inf }
 0x638   :  { %1178 = vmax.xlane.f32.xlu1 %v1177_v46 }
 0x63a   :  { %v1197_v28 = vpop.xlane.xlu0 %1196 }
 0x63b   :  { %1979 = vrcp.f32 %v1197_v28 }
 0x640   :  { %1205 = vadd.xlane.f32.xlu1 %v1204_v32 }
 0x641   :  { %v1980_v7 = vpop.eup %1979 }
 0x642   :  { %v1211_v24 = vmul.f32 %v1980_v7, %v1974_v5  ;;  %v802_v5 = vrot.slane %v793_v13, 7 }
 0x644   :  { %v2655_v11 = vadd.f32 %v802_v5, %v2515_v21  ;;  %v1999_v5 = vld [vmem:[%s2987_s0 + $0x2] sm:$0x3] }
 0x646   :  { %v839_v37 = vrot.slane %v2655_v11, 1 }
 0x648   :  { %1199 = vadd.xlane.f32.xlu1 %v1198_v52 }
 0x64d   :  { %v1941_v10 = vpop.permute.xlu0 %1940 }
 0x64e   :  { %v1943_v47 = vunpack.i.h.bf16 %v1941_v10  ;;  %v1942_v9 = vunpack.i.l.bf16 %v1941_v10 }
 0x650   :  { %1236 = vmatpush.msra.mxu3 %v1942_v9  ;;  %1314 = vmatpush.msrb.mxu2 %v1943_v47 }
 0x651   :  { %1913 = vmatmul.msk.f32.vlgmr.msra.gmra.mxu3 %vm199_vm8, %v1211_v24 }
 0x652   :  { %1406 = vmatpush.msra.mxu2 %v2300_v26  ;;  %1337 = vmatpush.msrb.mxu3 %v2312_v27  ;;  %v796_v26 = vrot.slane %v793_v13, 1 }
 0x654   :  { %1638 = vmatpush.msra.mxu3 %v2440_v31  ;;  %v2624_v27 = vadd.f32 %v796_v26, %v2492_v59  ;;  %v2627_v31 = vadd.f32 %v797_v14, %v2495_v60  ;;  %v800_v59 = vrot.slane %v793_v13, 5 }
 0x656   :  { %1639 = vmatpush.msra.mxu3 %v2445_v33  ;;  %v798_v33 = vrot.slane %v793_v13, 3  ;;  %v829_v53 = vrot.slane %v2627_v31, 6  ;;  %v2645_v12 = vadd.f32 %v800_v59, %v2507_v17  ;;  %v837_v17 = vrot.slane %v2650_v8, 2 }
 0x658   :  { %1640 = vmatpush.msra.mxu3 %v2451_v38  ;;  %v827_v38 = vrot.slane %v2624_v27, 7  ;;  %v2635_v15 = vadd.f32 %v798_v33, %v2498_v2 }
 0x65a   :  { %1641 = vmatpush.msra.mxu3 %v2457_v34  ;;  %v799_v34 = vrot.slane %v793_v13, 4  ;;  %v828_v54 = vsel %vm93_vm0, %v827_v38, %v2631_v19  ;;  %v831_v56 = vrot.slane %v2635_v15, 5 }
 0x65b   :  { %v830_v60 = vsel %vm96_vm1, %v829_v53, %v828_v54 }
 0x65c   :  { %v2640_v55 = vadd.f32 %v799_v34, %v2501_v16  ;;  %v832_v58 = vsel %vm99_vm2, %v831_v56, %v830_v60  ;;  %v835_v16 = vrot.slane %v2645_v12, 3 }
 0x65e   :  { %v833_v2 = vrot.slane %v2640_v55, 4 }
 0x660   :  { %v834_v41 = vsel %vm102_vm3, %v833_v2, %v832_v58 }
 0x661   :  { %1945 = vrot.lane.b32.xlu1 %v1944_v30, %s2035_s2  ;;  %v836_v29 = vsel %vm105_vm4, %v835_v16, %v834_v41  ;;  %v2000_v16 = vld [vmem:[%s2987_s0 + $0xe] sm:$0x3] }
 0x662   :  { %v838_v36 = vsel %vm108_vm5, %v837_v17, %v836_v29 }
 0x663   :  { %v840_v40 = vsel %vm111_vm6, %v839_v37, %v838_v36  ;;  %v2002_v36 = vld [vmem:[%s2987_s0 + $0x4] sm:$0x3] }
 0x664   :  { %v842_v18 = vsel %vm113_vm7, %v840_v40, 0.0  ;;  %v2003_v40 = vld [vmem:[%s2987_s0 + $0x6] sm:$0x3] }
 0x68b   :  { %843 = vadd.xlane.f32.xlu1 %v842_v18 }
 0x6ab   :  { %v1179_v43 = vpop.xlane.xlu1 %1178 }
 0x6ac   :  { %v1185_v46 = vsub.f32 %v2599_v45, %v1179_v43  ;;  %v2004_v43 = vld [vmem:[%s2987_s0 + $0x8] sm:$0x3] }
 0x6ae   :  { %v1191_v48 = vmul.f32 1.442695, %v1185_v46 }
 0x6b0   :  { %1981 = vpow2.f32 %v1191_v48  ;;  %v2005_v48 = vld [vmem:[%s2987_s0 + $0xa] sm:$0x3] }
 0x6b3   :  { %v1206_v21 = vpop.xlane.xlu1 %1205 }
 0x6b4   :  { %1983 = vrcp.f32 %v1206_v21 }
 0x6b6   :  { %v1982_v32 = vpop.eup %1981 }
 0x6b7   :  { %v1201_v28 = vsel %vm199_vm8, %v1982_v32, 0.0 }
 0x6b8   :  { %1202 = vadd.xlane.f32.xlu2 %v1201_v28 }
 0x6ba   :  { %v1984_v52 = vpop.eup %1983 }
 0x6bb   :  { %v1214_v7 = vmul.f32 %v1984_v52, %v2603_v49  ;;  %v1200_v10 = vpop.xlane.xlu1 %1199  ;;  %v2006_v52 = vld [vmem:[%s2987_s0 + $0xc] sm:$0x3] }
 0x6bc   :  { %1985 = vrcp.f32 %v1200_v10 }
 0x6bd   :  { %1916 = vmatmul.msk.f32.vlgmr.msrb.gmra.mxu2 %vm199_vm8, %v1214_v7 }
 0x6c2   :  { %v1986_v47 = vpop.eup %1985 }
 0x6c3   :  { %v1212_v13 = vmul.f32 %v1986_v47, %v2607_v51 }
 0x6d3   :  { %v1946_v9 = vpop.permute.xlu1 %1945 }
 0x6d4   :  { %v1948_v24 = vunpack.i.h.bf16 %v1946_v9  ;;  %v1947_v30 = vunpack.i.l.bf16 %v1946_v9  ;;  %v1238_v45 = vpop.f32.mrf.mxu3 }
 0x6d5   :  { %1917 = vmatmul.msk.f32.vlgmr.msrb.gmra.mxu3 %vm199_vm8, %v1238_v45 }
 0x6d6   :  { %1262 = vmatpush.msra.mxu0 %v1947_v30  ;;  %1288 = vmatpush.msrb.mxu1 %v1948_v24 }
 0x6d7   :  { %1914 = vmatmul.msk.f32.vlgmr.msra.gmra.mxu0 %vm199_vm8, %v1212_v13 }
 0x6d8   :  { %1383 = vmatpush.msra.mxu1 %v2294_v23  ;;  %1360 = vmatpush.msrb.mxu0 %v2288_v22 }
 0x6da   :  { %1658 = vmatpush.msra.mxu0 %v2540_v3 }
 0x6dc   :  { %1659 = vmatpush.msra.mxu0 %v2546_v20 }
 0x6de   :  { %1660 = vmatpush.msra.mxu0 %v2551_v35 }
 0x6e0   :  { %1661 = vmatpush.msra.mxu0 %v2557_v61 }
 0x6e2   :  { %1662 = vmatpush.msra.mxu0 %v2563_v62 }
 0x6e4   :  { %1663 = vmatpush.msra.mxu0 %v2570_v63 }
 0x6e6   :  { %1664 = vmatpush.msra.mxu0 %v2576_v0 }
 0x6e8   :  { %1665 = vmatpush.msra.mxu0 %v2582_v6 }
 0x72b   :  { %v1203_v49 = vpop.xlane.xlu2 %1202 }
 0x72c   :  { %1987 = vrcp.f32 %v1203_v49 }
 0x732   :  { %v1988_v23 = vpop.eup %1987 }
 0x733   :  { %v1213_v22 = vmul.f32 %v1988_v23, %v1982_v32 }
 0x735   :  { %1915 = vmatmul.msk.f32.vlgmr.msrb.gmra.mxu1 %vm199_vm8, %v1213_v22 }
 0x740   :  { %v1316_v3 = vpop.f32.mrf.mxu2 }
 0x741   :  { %1920 = vmatmul.msk.f32.vlgmr.msra.gmra.mxu2 %vm199_vm8, %v1316_v3 }
 0x754   :  { %v1264_v20 = vpop.f32.mrf.mxu0 }
 0x755   :  { %1918 = vmatmul.msk.f32.vlgmr.msrb.gmra.mxu0 %vm199_vm8, %v1264_v20 }
 0x758   :  { %v1339_v62 = vpop.f32.mrf.mxu3 }
 0x759   :  { %v1411_v0 = vsel %vm113_vm7, %v1339_v62, 0.0 }
 0x7b2   :  { %v1290_v35 = vpop.f32.mrf.mxu1 }
 0x7b3   :  { %1919 = vmatmul.msk.f32.vlgmr.msra.gmra.mxu1 %vm199_vm8, %v1290_v35 }
 0x7c4   :  { %v1408_v6 = vpop.f32.mrf.mxu2 }
 0x7c5   :  { %v1416_v38 = vsel %vm113_vm7, %v1408_v6, 0.0 }
 0x7d2   :  { %v1362_v61 = vpop.f32.mrf.mxu0 }
 0x7d3   :  { %v1412_v63 = vsel %vm113_vm7, %v1362_v61, 0.0 }
 0x7d4   :  { %v1413_v51 = vadd.f32 %v1412_v63, %v1411_v0 }
 0x830   :  { %v1385_v26 = vpop.f32.mrf.mxu1 }
 0x831   :  { %v1414_v14 = vsel %vm113_vm7, %v1385_v26, 0.0 }
 0x832   :  { %v1415_v33 = vadd.f32 %v1414_v14, %v1413_v51 }
 0x834   :  { %v1417_v34 = vadd.f32 %v1416_v38, %v1415_v33 }
 0x836   :  { %v1418_v53 = vadd.f32 %v1417_v34, %v552_v50  ;;  %v2001_v50 = vld [vmem:[%s2987_s0] sm:$0x3] }
 0x838   :  { %v1426_v54 = vrot.slane %v1418_v53, 6  ;;  %v1420_v59 = vrot.slane %v1418_v53, 7  ;;  %v1421_v60 = vrot.slane %v1418_v53, 1  ;;  %v1422_v56 = vrot.slane %v1418_v53, 2 }
 0x839   :  { %v1423_v57 = vrot.slane %v1418_v53, 3  ;;  %v1424_v58 = vrot.slane %v1418_v53, 4  ;;  %v1425_v2 = vrot.slane %v1418_v53, 5  ;;  %v1436_v41 = vadd.f32 %v1999_v5, %v1418_v53 }
 0x83a   :  { %v2696_v29 = vadd.f32 %v2000_v16, %v1426_v54  ;;  %v1435_v17 = vadd.f32 %v2001_v50, %v1420_v59  ;;  %v1437_v37 = vadd.f32 %v2002_v36, %v1421_v60  ;;  %v1438_v18 = vadd.f32 %v2003_v40, %v1422_v56 }
 0x83b   :  { %v1439_v46 = vadd.f32 %v2004_v43, %v1423_v57  ;;  %v1440_v21 = vadd.f32 %v2005_v48, %v1424_v58  ;;  %v1451_v32 = vrot.slane %v1436_v41, 7  ;;  %v1441_v7 = vadd.f32 %v2006_v52, %v1425_v2 }
 0x83c   :  { %v1463_v28 = vrot.slane %v2696_v29, 1  ;;  %v1453_v10 = vrot.slane %v1437_v37, 6  ;;  %v1455_v47 = vrot.slane %v1438_v18, 5 }
 0x83d   :  { %v1452_v9 = vsel %vm96_vm1, %v1451_v32, %v1435_v17  ;;  %v1457_v45 = vrot.slane %v1439_v46, 4  ;;  %v1459_v49 = vrot.slane %v1440_v21, 3  ;;  %v1461_v22 = vrot.slane %v1441_v7, 2 }
 0x83e   :  { %v1470_v24 = vsel %vm958_vm14, %v1463_v28, 0.0  ;;  %v1454_v30 = vsel %vm99_vm2, %v1453_v10, %v1452_v9 }
 0x83f   :  { %1471 = vadd.xlane.f32.xlu0 %v1470_v24  ;;  %v1456_v13 = vsel %vm102_vm3, %v1455_v47, %v1454_v30 }
 0x840   :  { %v1458_v23 = vsel %vm105_vm4, %v1457_v45, %v1456_v13 }
 0x841   :  { %v1460_v3 = vsel %vm108_vm5, %v1459_v49, %v1458_v23 }
 0x842   :  { %v1462_v20 = vsel %vm111_vm6, %v1461_v22, %v1460_v3 }
 0x843   :  { %v1467_v35 = vsel %vm1466_vm15, %v1462_v20, 0.0 }
 0x844   :  { %1468 = vadd.xlane.f32.xlu2 %v1467_v35 }
 0x8b2   :  { %v1472_v62 = vpop.xlane.xlu0 %1471 }
 0x8b3   :  { %v1474_v14 = vmul.f32 %v1472_v62, %v2381_v39 }
 0x8b7   :  { %v1469_v61 = vpop.xlane.xlu2 %1468 }
 0x8b8   :  { %v1473_v63 = vmul.f32 %v1469_v61, %v2381_v39 }
 0x8ba   :  { %v1477_v0 = vrot.slane %v1473_v63, 1  ;;  %v1478_v6 = vrot.slane %v1473_v63, 2  ;;  %v1479_v51 = vrot.slane %v1473_v63, 3  ;;  %v1480_v26 = vrot.slane %v1473_v63, 4 }
 0x8bb   :  { %v1481_v33 = vrot.slane %v1473_v63, 5  ;;  %v1482_v38 = vrot.slane %v1473_v63, 6  ;;  %v1492_v34 = vsub.f32 %v1435_v17, %v1473_v63 }
 0x8bc   :  { %v2727_v53 = vsub.f32 %v1436_v41, %v1477_v0  ;;  %v2729_v54 = vsub.f32 %v1437_v37, %v1478_v6  ;;  %v2731_v59 = vsub.f32 %v1438_v18, %v1479_v51  ;;  %v2733_v60 = vsub.f32 %v1439_v46, %v1480_v26 }
 0x8bd   :  { %v2735_v56 = vsub.f32 %v1440_v21, %v1481_v33  ;;  %v2737_v57 = vsub.f32 %v1441_v7, %v1482_v38  ;;  %v1483_v41 = vrot.slane %v1474_v14, 7  ;;  %v1500_v50 = vmul.f32 %v1492_v34, %v1492_v34 }
 0x8be   :  { %v1501_v58 = vmul.f32 %v2727_v53, %v2727_v53  ;;  %v1502_v2 = vmul.f32 %v2729_v54, %v2729_v54  ;;  %v1503_v5 = vmul.f32 %v2731_v59, %v2731_v59  ;;  %v1504_v16 = vmul.f32 %v2733_v60, %v2733_v60 }
 0x8bf   :  { %v1505_v17 = vmul.f32 %v2735_v56, %v2735_v56  ;;  %v1506_v40 = vmul.f32 %v2737_v57, %v2737_v57  ;;  %v2754_v21 = vsub.f32 %v2696_v29, %v1483_v41 }
 0x8c0   :  { %v1516_v36 = vrot.slane %v1501_v58, 7  ;;  %v1518_v37 = vrot.slane %v1502_v2, 6  ;;  %v1520_v43 = vrot.slane %v1503_v5, 5  ;;  %v1522_v48 = vrot.slane %v1504_v16, 4 }
 0x8c1   :  { %v1524_v28 = vrot.slane %v1505_v17, 3  ;;  %v1526_v7 = vrot.slane %v1506_v40, 2  ;;  %v1507_v24 = vmul.f32 %v2754_v21, %v2754_v21 }
 0x8c2   :  { %v1517_v18 = vsel %vm96_vm1, %v1516_v36, %v1500_v50 }
 0x8c3   :  { %v1519_v46 = vsel %vm99_vm2, %v1518_v37, %v1517_v18  ;;  %v1528_v30 = vrot.slane %v1507_v24, 1 }
 0x8c4   :  { %v1521_v32 = vsel %vm102_vm3, %v1520_v43, %v1519_v46 }
 0x8c5   :  { %v1523_v52 = vsel %vm105_vm4, %v1522_v48, %v1521_v32  ;;  %v1534_v29 = vsel %vm958_vm14, %v1528_v30, 0.0 }
 0x8c6   :  { %v1525_v10 = vsel %vm108_vm5, %v1524_v28, %v1523_v52 }
 0x8c7   :  { %v1527_v47 = vsel %vm111_vm6, %v1526_v7, %v1525_v10 }
 0x8c8   :  { %v1531_v9 = vsel %vm1466_vm15, %v1527_v47, 0.0 }
 0x8c9   :  { %1532 = vadd.xlane.f32.xlu2 %v1531_v9 }
 0x8d1   :  { %1535 = vadd.xlane.f32.xlu2 %v1534_v29 }
 0x93c   :  { %v1533_v45 = vpop.xlane.xlu2 %1532 }
 0x93d   :  { %v1537_v13 = vmul.f32 %v1533_v45, %v2381_v39 }
 0x93f   :  { %v1539_v49 = vadd.f32 1e-05, %v1537_v13 }
 0x941   :  { %1989 = vrsqrt.f32 %v1539_v49  ;;  %vm1547_vm9 = vweird.f32 %v1539_v49 }
 0x944   :  { %v1536_v23 = vpop.xlane.xlu2 %1535 }
 0x945   :  { %v1538_v22 = vmul.f32 %v1536_v23, %v2381_v39 }
 0x947   :  { %v1990_v3 = vpop.eup %1989  ;;  %v1540_v20 = vadd.f32 1e-05, %v1538_v22 }
 0x948   :  { %v1542_v35 = vmul.f32 %v1990_v3, %v1539_v49  ;;  %vm1548_vm8 = vweird.f32 %v1990_v3 }
 0x949   :  { %1991 = vrsqrt.f32 %v1540_v20  ;;  %vm1549_vm10 = vmor %vm1547_vm9, %vm1548_vm8  ;;  %vm1557_vm12 = vweird.f32 %v1540_v20 }
 0x94a   :  { %v1543_v61 = vmul.f32 %v1990_v3, %v1542_v35 }
 0x94c   :  { %v1544_v62 = vmul.f32 0.5, %v1543_v61 }
 0x94e   :  { %v1545_v63 = vsub.f32 1.5, %v1544_v62 }
 0x94f   :  { %v1992_v0 = vpop.eup %1991 }
 0x950   :  { %v1546_v6 = vmul.f32 %v1990_v3, %v1545_v63  ;;  %v1552_v51 = vmul.f32 %v1992_v0, %v1540_v20  ;;  %vm1558_vm11 = vweird.f32 %v1992_v0 }
 0x951   :  { %vm1559_vm8 = vmor %vm1557_vm12, %vm1558_vm11 }
 0x952   :  { %v1550_v26 = vsel %vm1549_vm10, %v1990_v3, %v1546_v6  ;;  %v1553_v14 = vmul.f32 %v1992_v0, %v1552_v51 }
 0x953   :  { %v1563_v33 = vrot.slane %v1550_v26, 1  ;;  %v1564_v38 = vrot.slane %v1550_v26, 2  ;;  %v1565_v58 = vrot.slane %v1550_v26, 3  ;;  %v1566_v2 = vrot.slane %v1550_v26, 4 }
 0x954   :  { %v1567_v5 = vrot.slane %v1550_v26, 5  ;;  %v1578_v41 = vmul.f32 %v1550_v26, %v1492_v34  ;;  %v1554_v16 = vmul.f32 0.5, %v1553_v14  ;;  %v1568_v50 = vrot.slane %v1550_v26, 6 }
 0x955   :  { %v1579_v17 = vmul.f32 %v1563_v33, %v2727_v53  ;;  %v1580_v36 = vmul.f32 %v1564_v38, %v2729_v54  ;;  %v1581_v37 = vmul.f32 %v1565_v58, %v2731_v59  ;;  %v1582_v40 = vmul.f32 %v1566_v2, %v2733_v60 }
 0x956   :  { %v1586_v18 = vmul.f32 %v1578_v41, %v2468_v1  ;;  %v1555_v43 = vsub.f32 1.5, %v1554_v16  ;;  %v1583_v46 = vmul.f32 %v1567_v5, %v2735_v56  ;;  %v1584_v48 = vmul.f32 %v1568_v50, %v2737_v57 }
 0x957   :  { %v1587_v32 = vmul.f32 %v1579_v17, %v2468_v1  ;;  %v1588_v34 = vmul.f32 %v1580_v36, %v2468_v1  ;;  %v1589_v28 = vmul.f32 %v1581_v37, %v2468_v1  ;;  %v1590_v53 = vmul.f32 %v1582_v40, %v2468_v1 }
 0x958   :  { %v1594_v54 = vadd.f32 %v1586_v18, %v2471_v4  ;;  %v1556_v59 = vmul.f32 %v1992_v0, %v1555_v43  ;;  %v1591_v60 = vmul.f32 %v1583_v46, %v2468_v1  ;;  %v1592_v47 = vmul.f32 %v1584_v48, %v2468_v1 }
 0x959   :  { %v1595_v56 = vadd.f32 %v1587_v32, %v2471_v4  ;;  %v1596_v57 = vadd.f32 %v1588_v34, %v2471_v4  ;;  %v1597_v52 = vadd.f32 %v1589_v28, %v2471_v4  ;;  %v1598_v7 = vadd.f32 %v1590_v53, %v2471_v4 }
 0x95a   :  { %v1560_v10 = vsel %vm1559_vm8, %v1992_v0, %v1556_v59  ;;  %v1610_v9 = vrot.slane %v1594_v54, 1  ;;  %v1599_v30 = vadd.f32 %v1591_v60, %v2471_v4  ;;  %v1600_v3 = vadd.f32 %v1592_v47, %v2471_v4 }
 0x95b   :  { %v1569_v24 = vrot.slane %v1560_v10, 7  ;;  %v1612_v29 = vrot.slane %v1596_v57, 7  ;;  %v1614_v45 = vrot.slane %v1597_v52, 6  ;;  %v1616_v22 = vrot.slane %v1598_v7, 5 }
 0x95c   :  { %v1611_v13 = vsel %vm93_vm0, %v1595_v56, %v1610_v9  ;;  %v1618_v62 = vrot.slane %v1599_v30, 4  ;;  %v1620_v6 = vrot.slane %v1600_v3, 3 }
 0x95d   :  { %v1585_v49 = vmul.f32 %v1569_v24, %v2754_v21  ;;  %v1613_v23 = vsel %vm96_vm1, %v1612_v29, %v1611_v13 }
 0x95e   :  { %v1615_v20 = vsel %vm99_vm2, %v1614_v45, %v1613_v23 }
 0x95f   :  { %v1593_v35 = vmul.f32 %v1585_v49, %v2468_v1  ;;  %v1617_v61 = vsel %vm102_vm3, %v1616_v22, %v1615_v20 }
 0x960   :  { %v1619_v0 = vsel %vm105_vm4, %v1618_v62, %v1617_v61 }
 0x961   :  { %v2794_v63 = vadd.f32 %v1593_v35, %v2471_v4  ;;  %v1621_v51 = vsel %vm108_vm5, %v1620_v6, %v1619_v0  ;;  %v844_v4 = vpop.xlane.xlu1 %843 }
 0x962   :  { %v845_v38 = vmul.f32 %v844_v4, %v2381_v39 }
 0x963   :  { %v1622_v21 = vrot.slane %v2794_v63, 2 }
 0x964   :  { %v847_v58 = vrot.slane %v845_v38, 1  ;;  %v848_v2 = vrot.slane %v845_v38, 2  ;;  %v849_v41 = vrot.slane %v845_v38, 3  ;;  %v850_v36 = vrot.slane %v845_v38, 4 }
 0x965   :  { %v1623_v26 = vsel %vm111_vm6, %v1622_v21, %v1621_v51  ;;  %v2816_v37 = vsub.f32 %v2631_v19, %v845_v38  ;;  %v851_v60 = vrot.slane %v845_v38, 5  ;;  %v852_v23 = vrot.slane %v845_v38, 6 }
 0x966   :  { %1921 = vmatmul.msk.f32.vlgmr.msra.gmra.mxu3 %vm113_vm7, %v1623_v26  ;;  %v2806_v5 = vsub.f32 %v2624_v27, %v847_v58  ;;  %v2809_v16 = vsub.f32 %v2627_v31, %v848_v2  ;;  %v2819_v40 = vsub.f32 %v2635_v15, %v849_v41  ;;  %v853_v0 = vrot.slane %v845_v38, 7 }
 0x967   :  { %v870_v24 = vmul.f32 %v2816_v37, %v2816_v37  ;;  %v2849_v26 = vsub.f32 %v2650_v8, %v852_v23 }
 0x968   :  { %v871_v17 = vmul.f32 %v2806_v5, %v2806_v5  ;;  %v872_v27 = vmul.f32 %v2809_v16, %v2809_v16 }
 0x969   :  { %v876_v38 = vmul.f32 %v2849_v26, %v2849_v26 }
 0x96a   :  { %v886_v44 = vrot.slane %v871_v17, 7  ;;  %v888_v45 = vrot.slane %v872_v27, 6 }
 0x9e9   :  { %v1643_v14 = vpop.f32.mrf.mxu3 }
 0x9ea   :  { %v1644_v1 = vadd.f32 %v1643_v14, %v724_v25 }
 0x9ec   :  { %v1646_v33 = vmax.f32 %v1644_v1, 0.0 }
 0x9ee   :  { %1922 = vmatmul.msk.f32.vlgmr.msra.gmra.mxu0 %vm771_vm13, %v1646_v33  ;;  %v2855_v33 = vsub.f32 %v2655_v11, %v853_v0 }
 0x9f0   :  { %v877_v8 = vmul.f32 %v2855_v33, %v2855_v33 }
 0x9f2   :  { %v898_v11 = vrot.slane %v877_v8, 1 }
 0xa6b   :  { %v1667_v50 = vpop.f32.mrf.mxu0 }
 0xa6c   :  { %v1668_v25 = vadd.f32 %v1667_v50, %v770_v42  ;;  %v896_v50 = vrot.slane %v876_v38, 2 }
 0xa6e   :  { %v1671_v18 = vrot.slane %v1668_v25, 7  ;;  %v1672_v31 = vrot.slane %v1668_v25, 1  ;;  %v1673_v43 = vrot.slane %v1668_v25, 2  ;;  %v1674_v46 = vrot.slane %v1668_v25, 3 }
 0xa6f   :  { %v1675_v48 = vrot.slane %v1668_v25, 4  ;;  %v1676_v32 = vrot.slane %v1668_v25, 5  ;;  %v2823_v34 = vadd.f32 %v1668_v25, %v1595_v56  ;;  %v2830_v56 = vsub.f32 %v2640_v55, %v850_v36 }
 0xa70   :  { %v1686_v42 = vadd.f32 %v1671_v18, %v1594_v54  ;;  %v1688_v28 = vadd.f32 %v1672_v31, %v1596_v57  ;;  %v1689_v53 = vadd.f32 %v1673_v43, %v1597_v52  ;;  %v1690_v19 = vadd.f32 %v1674_v46, %v1598_v7 }
 0xa71   :  { %v1691_v59 = vadd.f32 %v1675_v48, %v1599_v30  ;;  %v1702_v15 = vrot.slane %v2823_v34, 7  ;;  %v1692_v10 = vadd.f32 %v1676_v32, %v1600_v3  ;;  %v873_v52 = vmul.f32 %v2819_v40, %v2819_v40 }
 0xa72   :  { %v1704_v47 = vrot.slane %v1688_v28, 6  ;;  %v1706_v9 = vrot.slane %v1689_v53, 5  ;;  %v1708_v57 = vrot.slane %v1690_v19, 4  ;;  %v887_v7 = vsel %vm93_vm0, %v886_v44, %v870_v24 }
 0xa73   :  { %v1703_v29 = vsel %vm96_vm1, %v1702_v15, %v1686_v42  ;;  %v1710_v13 = vrot.slane %v1691_v59, 3  ;;  %v1677_v49 = vrot.slane %v1668_v25, 6  ;;  %v1712_v3 = vrot.slane %v1692_v10, 2 }
 0xa74   :  { %v1705_v54 = vsel %vm99_vm2, %v1704_v47, %v1703_v29  ;;  %v2839_v55 = vsub.f32 %v2645_v12, %v851_v60  ;;  %v874_v35 = vmul.f32 %v2830_v56, %v2830_v56  ;;  %v889_v61 = vsel %vm96_vm1, %v888_v45, %v887_v7 }
 0xa75   :  { %v1707_v30 = vsel %vm102_vm3, %v1706_v9, %v1705_v54  ;;  %v890_v6 = vrot.slane %v873_v52, 5  ;;  %v1693_v51 = vadd.f32 %v1677_v49, %v2794_v63 }
 0xa76   :  { %v1709_v22 = vsel %vm105_vm4, %v1708_v57, %v1707_v30  ;;  %v875_v12 = vmul.f32 %v2839_v55, %v2839_v55  ;;  %v892_v1 = vrot.slane %v874_v35, 4 }
 0xa77   :  { %v1711_v20 = vsel %vm108_vm5, %v1710_v13, %v1709_v22  ;;  %v891_v14 = vsel %vm99_vm2, %v890_v6, %v889_v61  ;;  %v1714_v4 = vrot.slane %v1693_v51, 1 }
 0xa78   :  { %v1713_v62 = vsel %vm111_vm6, %v1712_v3, %v1711_v20  ;;  %v893_v58 = vsel %vm102_vm3, %v892_v1, %v891_v14  ;;  %v894_v63 = vrot.slane %v875_v12, 3 }
 0xa79   :  { %v1717_v21 = vsel %vm1466_vm15, %v1713_v62, 0.0  ;;  %v1720_v41 = vsel %vm958_vm14, %v1714_v4, 0.0 }
 0xa7a   :  { %1718 = vadd.xlane.f32.xlu2 %v1717_v21  ;;  %v895_v2 = vsel %vm105_vm4, %v894_v63, %v893_v58 }
 0xa7b   :  { %v897_v17 = vsel %vm108_vm5, %v896_v50, %v895_v2 }
 0xa7c   :  { %v899_v25 = vsel %vm111_vm6, %v898_v11, %v897_v17  ;;  %v2007_v17 = vld [vmem:[%s2993_s6] sm:$0xff]  ;;  %s2037_s6 = smov [#allocation2]  }
 0xa7d   :  { %v901_v36 = vsel %vm113_vm7, %v899_v25, 0.0  ;;  %v2914_v11 = vperm.slane %v2007_v17, 5  ;;  %v2916_v25 = vperm.slane %v2007_v17, 6  ;;  %vm1852_vm7 = vcmask 254977   ;;  %s1865_s9 = sshll.u32 %s2037_s6, 4  ;;  %s1866_s9 = int_to_ptr.vmem [resolvable:$true] %s1865_s9 }
 0xa82   :  { %1721 = vadd.xlane.f32.xlu2 %v1720_v41 }
 0xa8a   :  { %902 = vadd.xlane.f32.xlu2 %v901_v36 }
 0xaed   :  { %v1719_v27 = vpop.xlane.xlu2 %1718 }
 0xaee   :  { %v1723_v18 = vmul.f32 %v1719_v27, %v2381_v39 }
 0xaf0   :  { %v1727_v31 = vrot.slane %v1723_v18, 1  ;;  %v1728_v43 = vrot.slane %v1723_v18, 2  ;;  %v1729_v46 = vrot.slane %v1723_v18, 3  ;;  %v1730_v48 = vrot.slane %v1723_v18, 4 }
 0xaf1   :  { %v1731_v32 = vrot.slane %v1723_v18, 5  ;;  %v1732_v44 = vrot.slane %v1723_v18, 6  ;;  %v2868_v15 = vsub.f32 %v1686_v42, %v1723_v18 }
 0xaf2   :  { %v2871_v60 = vsub.f32 %v2823_v34, %v1727_v31  ;;  %v2873_v47 = vsub.f32 %v1688_v28, %v1728_v43  ;;  %v2875_v9 = vsub.f32 %v1689_v53, %v1729_v46  ;;  %v2877_v24 = vsub.f32 %v1690_v19, %v1730_v48 }
 0xaf3   :  { %v2879_v29 = vsub.f32 %v1691_v59, %v1731_v32  ;;  %v2881_v45 = vsub.f32 %v1692_v10, %v1732_v44  ;;  %v1750_v28 = vmul.f32 %v2868_v15, %v2868_v15 }
 0xaf4   :  { %v1751_v54 = vmul.f32 %v2871_v60, %v2871_v60  ;;  %v1752_v42 = vmul.f32 %v2873_v47, %v2873_v47  ;;  %v1753_v34 = vmul.f32 %v2875_v9, %v2875_v9  ;;  %v1754_v53 = vmul.f32 %v2877_v24, %v2877_v24 }
 0xaf5   :  { %v1722_v57 = vpop.xlane.xlu2 %1721  ;;  %v1755_v59 = vmul.f32 %v2879_v29, %v2879_v29  ;;  %v1756_v7 = vmul.f32 %v2881_v45, %v2881_v45 }
 0xaf6   :  { %v1724_v19 = vmul.f32 %v1722_v57, %v2381_v39  ;;  %v1766_v10 = vrot.slane %v1751_v54, 7  ;;  %v1768_v52 = vrot.slane %v1752_v42, 6  ;;  %v1770_v49 = vrot.slane %v1753_v34, 5 }
 0xaf7   :  { %v1772_v22 = vrot.slane %v1754_v53, 4  ;;  %v1774_v35 = vrot.slane %v1755_v59, 3  ;;  %v1776_v62 = vrot.slane %v1756_v7, 2 }
 0xaf8   :  { %v1733_v30 = vrot.slane %v1724_v19, 7  ;;  %v1767_v13 = vsel %vm96_vm1, %v1766_v10, %v1750_v28 }
 0xaf9   :  { %v1769_v23 = vsel %vm99_vm2, %v1768_v52, %v1767_v13 }
 0xafa   :  { %v2900_v3 = vsub.f32 %v1693_v51, %v1733_v30  ;;  %v1771_v20 = vsel %vm102_vm3, %v1770_v49, %v1769_v23 }
 0xafb   :  { %v1773_v61 = vsel %vm105_vm4, %v1772_v22, %v1771_v20 }
 0xafc   :  { %v1775_v0 = vsel %vm108_vm5, %v1774_v35, %v1773_v61  ;;  %v1757_v6 = vmul.f32 %v2900_v3, %v2900_v3 }
 0xafd   :  { %v903_v21 = vpop.xlane.xlu2 %902  ;;  %v1777_v12 = vsel %vm111_vm6, %v1776_v62, %v1775_v0 }
 0xafe   :  { %v904_v14 = vmul.f32 %v903_v21, %v2381_v39  ;;  %v1781_v1 = vsel %vm1466_vm15, %v1777_v12, 0.0  ;;  %v1778_v51 = vrot.slane %v1757_v6, 1 }
 0xaff   :  { %1782 = vadd.xlane.f32.xlu0 %v1781_v1 }
 0xb00   :  { %v905_v4 = vadd.f32 1e-05, %v904_v14  ;;  %v1784_v38 = vsel %vm958_vm14, %v1778_v51, 0.0 }
 0xb01   :  { %1785 = vadd.xlane.f32.xlu2 %v1784_v38 }
 0xb02   :  { %1993 = vrsqrt.f32 %v905_v4  ;;  %vm912_vm1 = vweird.f32 %v905_v4 }
 0xb08   :  { %v1994_v58 = vpop.eup %1993 }
 0xb09   :  { %v907_v63 = vmul.f32 %v1994_v58, %v905_v4  ;;  %vm913_vm0 = vweird.f32 %v1994_v58 }
 0xb0a   :  { %vm914_vm2 = vmor %vm912_vm1, %vm913_vm0 }
 0xb0b   :  { %v908_v8 = vmul.f32 %v1994_v58, %v907_v63 }
 0xb0d   :  { %v909_v2 = vmul.f32 0.5, %v908_v8 }
 0xb0f   :  { %v910_v41 = vsub.f32 1.5, %v909_v2 }
 0xb11   :  { %v911_v50 = vmul.f32 %v1994_v58, %v910_v41 }
 0xb13   :  { %v915_v36 = vsel %vm914_vm2, %v1994_v58, %v911_v50 }
 0xb14   :  { %v917_v27 = vrot.slane %v915_v36, 1  ;;  %v918_v18 = vrot.slane %v915_v36, 2  ;;  %v919_v31 = vrot.slane %v915_v36, 3  ;;  %v920_v43 = vrot.slane %v915_v36, 4 }
 0xb15   :  { %v921_v46 = vrot.slane %v915_v36, 5  ;;  %v922_v48 = vrot.slane %v915_v36, 6  ;;  %v923_v32 = vrot.slane %v915_v36, 7  ;;  %v932_v44 = vmul.f32 %v915_v36, %v2816_v37 }
 0xb16   :  { %v933_v54 = vmul.f32 %v917_v27, %v2806_v5  ;;  %v934_v42 = vmul.f32 %v918_v18, %v2809_v16  ;;  %v935_v34 = vmul.f32 %v919_v31, %v2819_v40  ;;  %v936_v57 = vmul.f32 %v920_v43, %v2830_v56 }
 0xb17   :  { %v937_v28 = vmul.f32 %v921_v46, %v2839_v55  ;;  %v938_v53 = vmul.f32 %v922_v48, %v2849_v26  ;;  %v939_v19 = vmul.f32 %v923_v32, %v2855_v33  ;;  %v941_v59 = vmul.f32 %v2914_v11, %v932_v44 }
 0xb18   :  { %v942_v10 = vmul.f32 %v2914_v11, %v933_v54  ;;  %v943_v37 = vmul.f32 %v2914_v11, %v934_v42  ;;  %v944_v5 = vmul.f32 %v2914_v11, %v935_v34  ;;  %v945_v16 = vmul.f32 %v2914_v11, %v936_v57 }
 0xb19   :  { %v946_v40 = vmul.f32 %v2914_v11, %v937_v28  ;;  %v947_v56 = vmul.f32 %v2914_v11, %v938_v53  ;;  %v950_v55 = vadd.f32 %v2916_v25, %v941_v59  ;;  %v948_v26 = vmul.f32 %v2914_v11, %v939_v19 }
 0xb1a   :  { %v951_v33 = vadd.f32 %v2916_v25, %v942_v10  ;;  %v952_v52 = vadd.f32 %v2916_v25, %v943_v37  ;;  %v953_v7 = vadd.f32 %v2916_v25, %v944_v5  ;;  %v954_v30 = vadd.f32 %v2916_v25, %v945_v16 }
 0xb1b   :  { %959 = vst.msk [vmem:[#allocation2] sm:$0x1] %vm958_vm14, %v950_v55  ;;  %v955_v13 = vadd.f32 %v2916_v25, %v946_v40  ;;  %v956_v49 = vadd.f32 %v2916_v25, %v947_v56  ;;  %v957_v23 = vadd.f32 %v2916_v25, %v948_v26 }
 0xb1c   :  { %960 = vst.msk [vmem:[#allocation2 + $0x2] sm:$0x1] %vm958_vm14, %v951_v33 }
 0xb1d   :  { %961 = vst.msk [vmem:[#allocation2 + $0x4] sm:$0x1] %vm958_vm14, %v952_v52 }
 0xb1e   :  { %962 = vst.msk [vmem:[#allocation2 + $0x6] sm:$0x1] %vm958_vm14, %v953_v7 }
 0xb1f   :  { %963 = vst.msk [vmem:[#allocation2 + $0x8] sm:$0x1] %vm958_vm14, %v954_v30 }
 0xb20   :  { %964 = vst.msk [vmem:[#allocation2 + $0xa] sm:$0x1] %vm958_vm14, %v955_v13 }
 0xb21   :  { %965 = vst.msk [vmem:[#allocation2 + $0xc] sm:$0x1] %vm958_vm14, %v956_v49 }
 0xb22   :  { %966 = vst.msk [vmem:[#allocation2 + $0xe] sm:$0x1] %vm958_vm14, %v957_v23 }
 0xb72   :  { %v1783_v22 = vpop.xlane.xlu0 %1782 }
 0xb73   :  { %v1787_v20 = vmul.f32 %v1783_v22, %v2381_v39 }
 0xb74   :  { %v1786_v35 = vpop.xlane.xlu2 %1785 }
 0xb75   :  { %v1789_v61 = vadd.f32 1e-05, %v1787_v20  ;;  %v1788_v62 = vmul.f32 %v1786_v35, %v2381_v39 }
 0xb77   :  { %1995 = vrsqrt.f32 %v1789_v61  ;;  %v1790_v0 = vadd.f32 1e-05, %v1788_v62  ;;  %vm1797_vm4 = vweird.f32 %v1789_v61 }
 0xb79   :  { %1997 = vrsqrt.f32 %v1790_v0  ;;  %vm1807_vm13 = vweird.f32 %v1790_v0 }
 0xb7d   :  { %v1996_v6 = vpop.eup %1995 }
 0xb7e   :  { %v1792_v21 = vmul.f32 %v1996_v6, %v1789_v61  ;;  %vm1798_vm3 = vweird.f32 %v1996_v6 }
 0xb7f   :  { %v1998_v12 = vpop.eup %1997  ;;  %vm1799_vm6 = vmor %vm1797_vm4, %vm1798_vm3 }
 0xb80   :  { %v1793_v14 = vmul.f32 %v1996_v6, %v1792_v21  ;;  %v1802_v1 = vmul.f32 %v1998_v12, %v1790_v0  ;;  %vm1808_vm5 = vweird.f32 %v1998_v12 }
 0xb81   :  { %vm1809_vm14 = vmor %vm1807_vm13, %vm1808_vm5 }
 0xb82   :  { %v1794_v51 = vmul.f32 0.5, %v1793_v14  ;;  %v1803_v4 = vmul.f32 %v1998_v12, %v1802_v1 }
 0xb84   :  { %v1795_v38 = vsub.f32 1.5, %v1794_v51  ;;  %v1804_v58 = vmul.f32 0.5, %v1803_v4 }
 0xb86   :  { %v1796_v63 = vmul.f32 %v1996_v6, %v1795_v38  ;;  %v1805_v8 = vsub.f32 1.5, %v1804_v58 }
 0xb88   :  { %v1800_v39 = vsel %vm1799_vm6, %v1996_v6, %v1796_v63  ;;  %v1806_v2 = vmul.f32 %v1998_v12, %v1805_v8 }
 0xb89   :  { %v1813_v41 = vrot.slane %v1800_v39, 1  ;;  %v1814_v50 = vrot.slane %v1800_v39, 2  ;;  %v1815_v17 = vrot.slane %v1800_v39, 3  ;;  %v1816_v36 = vrot.slane %v1800_v39, 4 }
 0xb8a   :  { %v1817_v27 = vrot.slane %v1800_v39, 5  ;;  %v1818_v18 = vrot.slane %v1800_v39, 6  ;;  %v1828_v31 = vmul.f32 %v1800_v39, %v2868_v15  ;;  %v1810_v43 = vsel %vm1809_vm14, %v1998_v12, %v1806_v2 }
 0xb8b   :  { %v1829_v46 = vmul.f32 %v1813_v41, %v2871_v60  ;;  %v1830_v48 = vmul.f32 %v1814_v50, %v2873_v47  ;;  %v1831_v32 = vmul.f32 %v1815_v17, %v2875_v9  ;;  %v1832_v44 = vmul.f32 %v1816_v36, %v2877_v24 }
 0xb8c   :  { %v1833_v54 = vmul.f32 %v1817_v27, %v2879_v29  ;;  %v1834_v42 = vmul.f32 %v1818_v18, %v2881_v45  ;;  %v1836_v34 = vmul.f32 %v1828_v31, %v2914_v11  ;;  %v1819_v57 = vrot.slane %v1810_v43, 7 }
 0xb8d   :  { %v1837_v28 = vmul.f32 %v1829_v46, %v2914_v11  ;;  %v1838_v15 = vmul.f32 %v1830_v48, %v2914_v11  ;;  %v1839_v53 = vmul.f32 %v1831_v32, %v2914_v11  ;;  %v1840_v60 = vmul.f32 %v1832_v44, %v2914_v11 }
 0xb8e   :  { %v1841_v47 = vmul.f32 %v1833_v54, %v2914_v11  ;;  %v1842_v9 = vmul.f32 %v1834_v42, %v2914_v11  ;;  %v1844_v24 = vadd.f32 %v1836_v34, %v2916_v25  ;;  %v1835_v29 = vmul.f32 %v1819_v57, %v2900_v3 }
 0xb8f   :  { %v1845_v45 = vadd.f32 %v1837_v28, %v2916_v25  ;;  %v1846_v19 = vadd.f32 %v1838_v15, %v2916_v25  ;;  %v1847_v59 = vadd.f32 %v1839_v53, %v2916_v25  ;;  %v1848_v10 = vadd.f32 %v1840_v60, %v2916_v25 }
 0xb90   :  { %1853 = vst.msk [vmem:[#allocation2] sm:$0x2] %vm1852_vm7, %v1844_v24  ;;  %v1843_v37 = vmul.f32 %v1835_v29, %v2914_v11  ;;  %v1849_v5 = vadd.f32 %v1841_v47, %v2916_v25  ;;  %v1850_v3 = vadd.f32 %v1842_v9, %v2916_v25 }
 0xb91   :  { %1854 = vst.msk [vmem:[#allocation2 + $0x2] sm:$0x2] %vm1852_vm7, %v1845_v45 }
 0xb92   :  { %1855 = vst.msk [vmem:[#allocation2 + $0x4] sm:$0x2] %vm1852_vm7, %v1846_v19  ;;  %v1851_v16 = vadd.f32 %v1843_v37, %v2916_v25 }
 0xb93   :  { %1856 = vst.msk [vmem:[#allocation2 + $0x6] sm:$0x2] %vm1852_vm7, %v1847_v59 }
 0xb94   :  { %1857 = vst.msk [vmem:[#allocation2 + $0x8] sm:$0x2] %vm1852_vm7, %v1848_v10 }
 0xb95   :  { %1858 = vst.msk [vmem:[#allocation2 + $0xa] sm:$0x2] %vm1852_vm7, %v1849_v5 }
 0xb96   :  { %1859 = vst.msk [vmem:[#allocation2 + $0xc] sm:$0x2] %vm1852_vm7, %v1850_v3 }
 0xb97   :  { %1860 = vst.msk [vmem:[#allocation2 + $0xe] sm:$0x2] %vm1852_vm7, %v1851_v16 }
 0xb98   :  { %1873 = dma.vmem_to_hbm [thread:$0]  %s1866_s9, 256, %s1868_s12, [#allocation3], %s2038_s13, %s2038_s13, %s2039_s7  }
 0xb99   :  { %2032 = dma.done.wait [#allocation3], 256  }
 0xb9a   :  { %2033 = vsyncadd [#allocation3], 4294967040 }
 0xb9b   :  { %1878 = vsyncpa [#allocation3], 1 }

</bundles_post_ra>
